<compile_context>
chip_gen: v6e
topology: v6e:2x2x1
jax: 0.10.0
libtpu: 0.0.40
codegen_flags: <defaults>
</compile_context>

<pallas_src>
import functools

import jax
import jax.numpy as jnp
from jax.experimental import pallas as pl
from jax.experimental.pallas import tpu as pltpu

GATE = 128  # lanes per gate block (gate-aligned layout); 3 gates -> 384 lanes


def gru_classifier_kernel(seq_ref, slab_ref, out_ref, *,
                          seq_len, hidden_dim, num_classes, vocab_pad,
                          row_gi, row_whh, row_bhn, row_wout, row_bout):
    T, H, C = seq_len, hidden_dim, num_classes
    G = GATE
    W3 = 3 * G

    # ---- input path: one-hot (T,Vp) @ gi_table (Vp,3G) on the MXU ------------
    # gi_table rows are emb @ W_ih + b_ih (+ b_hh for r,z), gate-aligned, so the
    # whole embedding lookup + input-side gate computation is ONE matmul.
    seq_col = seq_ref[...]                                              # (T, 1) int32
    vocab_iota = jax.lax.broadcasted_iota(jnp.int32, (T, vocab_pad), 1)
    one_hot = (vocab_iota == seq_col).astype(jnp.float32)               # (T, Vp)
    gi_all = jnp.dot(one_hot, slab_ref[row_gi:row_gi + vocab_pad, :],
                     preferred_element_type=jnp.float32)                # (T, 3G)

    # ---- recurrent weights/biases loaded into vregs ONCE, outside the loop ---
    w_hh = slab_ref[row_whh:row_whh + G, :]      # (128, 3G); rows >= H are zero
    b_hn = slab_ref[row_bhn:row_bhn + 1, :]      # (1, 3G):  0 | 0 | b_hh_n

    # ---- serial recurrence (T=8, fully unrolled): one MXU matmul + one fused
    #      sigmoid + one tanh per step; all gate slices are whole vregs ---------
    h = jnp.zeros((1, G), dtype=jnp.float32)     # padding lanes [H:128) stay 0
    for t in range(T):
        gh = jnp.dot(h, w_hh, preferred_element_type=jnp.float32) + b_hn  # (1, 3G)
        gi = gi_all[t:t + 1, :]                                           # static row
        rz = jax.nn.sigmoid(gi[:, 0:2 * G] + gh[:, 0:2 * G])   # r,z in one EUP call
        r = rz[:, 0:G]
        z = rz[:, G:2 * G]
        n = jnp.tanh(gi[:, 2 * G:W3] + r * gh[:, 2 * G:W3])    # gh_n already has b_hh_n
        h = (1.0 - z) * n + z * h                               # PyTorch GRU update

    # ---- classifier head: Linear -> ReLU -> log_softmax ----------------------
    # TODO(synk): F.dropout(p=0.5) is stochastic; identity here (inference semantics).
    w_out = slab_ref[row_wout:row_wout + G, :]   # (128, 3G); W_out in rows [0:H), lanes [0:C)
    b_out = slab_ref[row_bout:row_bout + 1, :]   # (1, 3G);   b_out in lanes [0:C)
    logits = jnp.dot(h, w_out, preferred_element_type=jnp.float32) + b_out  # (1, 3G)
    zh = jnp.maximum(logits[:, 0:C], 0.0)                        # ReLU, valid lanes only
    m = jnp.max(zh, axis=1, keepdims=True)                       # log_softmax over dim=1
    lse = jnp.log(jnp.sum(jnp.exp(zh - m), axis=1, keepdims=True)) + m
    out_ref[...] = (zh - lse).astype(out_ref.dtype)


# ----------------------------- parameter packing ------------------------------
def _pad_rows(x, rows):
    return jnp.pad(x, ((0, rows - x.shape[0]), (0, 0)))


def _gate_concat(blocks, hidden_dim):
    # each block (rows, H) -> pad lanes to GATE; concat gates -> (rows, 3*GATE)
    return jnp.concatenate(
        [jnp.pad(b, ((0, 0), (0, GATE - hidden_dim))) for b in blocks], axis=1)


def prepare_params(params):
    """One-time parameter fusion/packing (hoisted out of the per-call hot path).

    Single lane-dense f32 slab, last dim = 3*128 = 384, 8-row-aligned segments:
      [row_gi  : +Vp )  gi_table = emb @ W_ih + (b_ih + b_hh for r,z; b_ih for n)
      [row_whh : +128)  W_hh gate-aligned, zero-padded to 128 rows
      [row_bhn : +8  )  row 0 = b_hh_n in the n-gate block, rest zero
      [row_wout: +128)  W_out in rows [0:H), lanes [0:C)
      [row_bout: +8  )  row 0 = b_out in lanes [0:C)
    Gate order is PyTorch's (r, z, n).
    """
    emb, w_ih, w_hh, b_ih, b_hh, w_out, b_out = params
    V, _ = emb.shape
    H = w_hh.shape[-1]
    C = w_out.shape[-1]
    assert H <= GATE and C <= GATE

    Vp = ((V + 7) // 8) * 8

    w_ih_g = _gate_concat([w_ih[0], w_ih[1], w_ih[2]], H)                      # (E, 3G)
    b_gi = _gate_concat([b_ih[0] + b_hh[0], b_ih[1] + b_hh[1], b_ih[2]], H)    # (1, 3G)
    gi_table = _pad_rows(emb @ w_ih_g + b_gi, Vp)                              # (Vp, 3G)

    w_hh_g = _pad_rows(_gate_concat([w_hh[0], w_hh[1], w_hh[2]], H), GATE)     # (128, 3G)
    zero_b = jnp.zeros_like(b_hh[2])
    b_hn = _pad_rows(_gate_concat([zero_b, zero_b, b_hh[2]], H), 8)            # (8, 3G)

    w_out_g = _pad_rows(jnp.pad(w_out, ((0, 0), (0, 3 * GATE - C))), GATE)     # (128, 3G)
    b_out_g = _pad_rows(jnp.pad(b_out, ((0, 0), (0, 3 * GATE - C))), 8)        # (8, 3G)

    slab = jnp.concatenate([gi_table, w_hh_g, b_hn, w_out_g, b_out_g],
                           axis=0).astype(jnp.float32)
    meta = dict(vocab_size=V, vocab_pad=Vp, hidden_dim=H, num_classes=C,
                row_gi=0, row_whh=Vp, row_bhn=Vp + GATE,
                row_wout=Vp + GATE + 8, row_bout=Vp + 2 * GATE + 8)
    return slab, meta


def build_forward(meta, seq_len):
    T = seq_len
    V = meta["vocab_size"]
    C = meta["num_classes"]
    total_rows = meta["row_bout"] + 8

    kernel = functools.partial(
        gru_classifier_kernel,
        seq_len=T, hidden_dim=meta["hidden_dim"], num_classes=C,
        vocab_pad=meta["vocab_pad"], row_gi=meta["row_gi"],
        row_whh=meta["row_whh"], row_bhn=meta["row_bhn"],
        row_wout=meta["row_wout"], row_bout=meta["row_bout"])

    call = pl.pallas_call(
        kernel,
        out_shape=jax.ShapeDtypeStruct((1, C), jnp.float32),
        grid_spec=pltpu.PrefetchScalarGridSpec(
            num_scalar_prefetch=0,
            grid=(1,),
            in_specs=[
                pl.BlockSpec((T, 1), lambda i: (0, 0)),                 # token ids
                pl.BlockSpec((total_rows, 3 * GATE), lambda i: (0, 0)),  # packed params
            ],
            out_specs=pl.BlockSpec((1, C), lambda i: (0, 0)),
        ),
        compiler_params=pltpu.CompilerParams(
            dimension_semantics=("arbitrary",),
            vmem_limit_bytes=32 * 1024 * 1024),
    )

    @jax.jit
    def forward(seq, slab):
        # Clamp ids (no runtime OOB check on VMEM refs; also keeps the one-hot
        # gather well-defined) and present them as a (T,1) column for the kernel.
        seq2d = jnp.clip(seq.astype(jnp.int32), 0, V - 1).reshape(T, 1)
        return call(seq2d, slab)

    return forward


# ------------------------------- reference ------------------------------------
def reference_forward(seq, params):
    """Pure-JAX reference mirroring the PyTorch forward (dropout disabled)."""
    emb, w_ih, w_hh, b_ih, b_hh, w_out, b_out = params
    x = emb[seq]  # (T, E)
    H = w_hh.shape[-1]

    def step(h, xt):
        xt = xt[None, :]
        r = jax.nn.sigmoid(xt @ w_ih[0] + b_ih[0] + h @ w_hh[0] + b_hh[0])
        z = jax.nn.sigmoid(xt @ w_ih[1] + b_ih[1] + h @ w_hh[1] + b_hh[1])
        n = jnp.tanh(xt @ w_ih[2] + b_ih[2] + r * (h @ w_hh[2] + b_hh[2]))
        return (1.0 - z) * n + z * h, None

    h0 = jnp.zeros((1, H), jnp.float32)
    hT, _ = jax.lax.scan(step, h0, x)
    logits = hT @ w_out + b_out
    zh = jnp.maximum(logits, 0.0)
    return jax.nn.log_softmax(zh, axis=1)


def init_params(key, vocab_size, embedding_dim, hidden_dim, num_classes):
    kE, k1, k2, k3, k4, k5, k6 = jax.random.split(key, 7)
    k = 1.0 / jnp.sqrt(hidden_dim)
    emb = 0.1 * jax.random.normal(kE, (vocab_size, embedding_dim), jnp.float32)
    emb = emb.at[0].set(0.0)  # padding_idx=0
    w_ih = jax.random.uniform(k1, (3, embedding_dim, hidden_dim), jnp.float32, -k, k)
    w_hh = jax.random.uniform(k2, (3, hidden_dim, hidden_dim), jnp.float32, -k, k)
    b_ih = jax.random.uniform(k3, (3, 1, hidden_dim), jnp.float32, -k, k)
    b_hh = jax.random.uniform(k4, (3, 1, hidden_dim), jnp.float32, -k, k)
    kl = 1.0 / jnp.sqrt(hidden_dim)
    w_out = jax.random.uniform(k5, (hidden_dim, num_classes), jnp.float32, -kl, kl)
    b_out = jax.random.uniform(k6, (1, num_classes), jnp.float32, -kl, kl)
    return (emb, w_ih, w_hh, b_ih, b_hh, w_out, b_out)


if __name__ == "__main__":
    vocab_size, embedding_dim, hidden_dim, num_classes = 32, 16, 32, 8
    seq_len = 8

    key = jax.random.PRNGKey(0)
    kp, ks = jax.random.split(key)
    params = init_params(kp, vocab_size, embedding_dim, hidden_dim, num_classes)
    seq = jax.random.randint(ks, (seq_len,), 0, vocab_size, dtype=jnp.int32)

    # One-time fusion/packing (not in the per-call hot path).
    slab, meta = prepare_params(params)
    forward = build_forward(meta, seq_len)

    out = jax.block_until_ready(forward(seq, slab))
    ref = reference_forward(seq, params)
    assert out.shape == (1, num_classes)
    assert jnp.allclose(out, ref, atol=1e-2, rtol=1e-2), (out, ref)

    print("KERNEL_OK")
</pallas_src>

<mosaic_0001>
module attributes {stable_mosaic.version = 11 : i64} {
  func.func @gru_classifier_kernel(%arg0: i32, %arg1: memref<8x1xi32, #tpu.memory_space<vmem>>, %arg2: memref<304x384xf32, #tpu.memory_space<vmem>>, %arg3: memref<1x8xf32, #tpu.memory_space<vmem>>) attributes {dimension_semantics = [#tpu.dimension_semantics<arbitrary>], iteration_bounds = array<i64: 1>, scalar_prefetch = 0 : i64, scratch_operands = 0 : i64, tpu.core_type = #tpu.core_type<tc>, window_params = [{pipeline_mode = #tpu.pipeline_mode<synchronous>, transform_indices = @transform_0, window_bounds = array<i64: 8, 1>}, {pipeline_mode = #tpu.pipeline_mode<synchronous>, transform_indices = @transform_1, window_bounds = array<i64: 304, 384>}, {pipeline_mode = #tpu.pipeline_mode<synchronous>, transform_indices = @transform_2, window_bounds = array<i64: 1, 8>}]} {
    %c0 = arith.constant 0 : index
    %c0_0 = arith.constant 0 : index
    %0 = vector.load %arg1[%c0, %c0_0] : memref<8x1xi32, #tpu.memory_space<vmem>>, vector<8x1xi32>
    %1 = tpu.iota {dimensions = array<i32: 1>} : vector<8x32xi32>
    %2 = vector.broadcast %0 : vector<8x1xi32> to vector<8x32xi32>
    %3 = arith.cmpi eq, %1, %2 : vector<8x32xi32>
    %4 = arith.extui %3 : vector<8x32xi1> to vector<8x32xi32>
    %5 = arith.sitofp %4 : vector<8x32xi32> to vector<8x32xf32>
    %c0_1 = arith.constant 0 : index
    %c0_2 = arith.constant 0 : index
    %6 = vector.load %arg2[%c0_1, %c0_2] : memref<304x384xf32, #tpu.memory_space<vmem>>, vector<32x384xf32>
    %cst = arith.constant dense<0.000000e+00> : vector<8x384xf32>
    %7 = tpu.matmul %5, %6, %cst {dimension_numbers = #tpu.dot_dimension_numbers<[1], [0], [0], [1], [0, 0, 1, 1], [], []>} : vector<8x32xf32>, vector<32x384xf32>, vector<8x384xf32> -> vector<8x384xf32>
    %c32 = arith.constant 32 : index
    %c0_3 = arith.constant 0 : index
    %8 = vector.load %arg2[%c32, %c0_3] : memref<304x384xf32, #tpu.memory_space<vmem>>, vector<128x384xf32>
    %c160 = arith.constant 160 : index
    %c0_4 = arith.constant 0 : index
    %9 = vector.load %arg2[%c160, %c0_4] : memref<304x384xf32, #tpu.memory_space<vmem>>, vector<1x384xf32>
    %cst_5 = arith.constant 0.000000e+00 : f32
    %10 = vector.broadcast %cst_5 : f32 to vector<1x128xf32>
    %cst_6 = arith.constant dense<0.000000e+00> : vector<1x384xf32>
    %11 = tpu.matmul %10, %8, %cst_6 {dimension_numbers = #tpu.dot_dimension_numbers<[1], [0], [0], [1], [0, 0, 1, 1], [], []>} : vector<1x128xf32>, vector<128x384xf32>, vector<1x384xf32> -> vector<1x384xf32>
    %12 = arith.addf %11, %9 : vector<1x384xf32>
    %13 = vector.extract_strided_slice %7 {offsets = [0, 0], sizes = [1, 384], strides = [1, 1]} : vector<8x384xf32> to vector<1x384xf32>
    %14 = vector.extract_strided_slice %13 {offsets = [0, 0], sizes = [1, 256], strides = [1, 1]} : vector<1x384xf32> to vector<1x256xf32>
    %15 = vector.extract_strided_slice %12 {offsets = [0, 0], sizes = [1, 256], strides = [1, 1]} : vector<1x384xf32> to vector<1x256xf32>
    %16 = arith.addf %14, %15 : vector<1x256xf32>
    %17 = arith.negf %16 : vector<1x256xf32>
    %18 = math.exp %17 : vector<1x256xf32>
    %cst_7 = arith.constant 1.000000e+00 : f32
    %19 = vector.broadcast %cst_7 : f32 to vector<1x256xf32>
    %20 = arith.addf %19, %18 : vector<1x256xf32>
    %21 = arith.divf %19, %20 : vector<1x256xf32>
    %22 = vector.extract_strided_slice %21 {offsets = [0, 0], sizes = [1, 128], strides = [1, 1]} : vector<1x256xf32> to vector<1x128xf32>
    %23 = vector.extract_strided_slice %21 {offsets = [0, 128], sizes = [1, 128], strides = [1, 1]} : vector<1x256xf32> to vector<1x128xf32>
    %24 = vector.extract_strided_slice %13 {offsets = [0, 256], sizes = [1, 128], strides = [1, 1]} : vector<1x384xf32> to vector<1x128xf32>
    %25 = vector.extract_strided_slice %12 {offsets = [0, 256], sizes = [1, 128], strides = [1, 1]} : vector<1x384xf32> to vector<1x128xf32>
    %26 = arith.mulf %22, %25 : vector<1x128xf32>
    %27 = arith.addf %24, %26 : vector<1x128xf32>
    %28 = math.tanh %27 : vector<1x128xf32>
    %cst_8 = arith.constant 1.000000e+00 : f32
    %29 = vector.broadcast %cst_8 : f32 to vector<1x128xf32>
    %30 = arith.subf %29, %23 : vector<1x128xf32>
    %31 = arith.mulf %30, %28 : vector<1x128xf32>
    %32 = arith.mulf %23, %10 : vector<1x128xf32>
    %33 = arith.addf %31, %32 : vector<1x128xf32>
    %cst_9 = arith.constant dense<0.000000e+00> : vector<1x384xf32>
    %34 = tpu.matmul %33, %8, %cst_9 {dimension_numbers = #tpu.dot_dimension_numbers<[1], [0], [0], [1], [0, 0, 1, 1], [], []>} : vector<1x128xf32>, vector<128x384xf32>, vector<1x384xf32> -> vector<1x384xf32>
    %35 = arith.addf %34, %9 : vector<1x384xf32>
    %36 = vector.extract_strided_slice %7 {offsets = [1, 0], sizes = [1, 384], strides = [1, 1]} : vector<8x384xf32> to vector<1x384xf32>
    %37 = vector.extract_strided_slice %36 {offsets = [0, 0], sizes = [1, 256], strides = [1, 1]} : vector<1x384xf32> to vector<1x256xf32>
    %38 = vector.extract_strided_slice %35 {offsets = [0, 0], sizes = [1, 256], strides = [1, 1]} : vector<1x384xf32> to vector<1x256xf32>
    %39 = arith.addf %37, %38 : vector<1x256xf32>
    %40 = arith.negf %39 : vector<1x256xf32>
    %41 = math.exp %40 : vector<1x256xf32>
    %cst_10 = arith.constant 1.000000e+00 : f32
    %42 = vector.broadcast %cst_10 : f32 to vector<1x256xf32>
    %43 = arith.addf %42, %41 : vector<1x256xf32>
    %44 = arith.divf %42, %43 : vector<1x256xf32>
    %45 = vector.extract_strided_slice %44 {offsets = [0, 0], sizes = [1, 128], strides = [1, 1]} : vector<1x256xf32> to vector<1x128xf32>
    %46 = vector.extract_strided_slice %44 {offsets = [0, 128], sizes = [1, 128], strides = [1, 1]} : vector<1x256xf32> to vector<1x128xf32>
    %47 = vector.extract_strided_slice %36 {offsets = [0, 256], sizes = [1, 128], strides = [1, 1]} : vector<1x384xf32> to vector<1x128xf32>
    %48 = vector.extract_strided_slice %35 {offsets = [0, 256], sizes = [1, 128], strides = [1, 1]} : vector<1x384xf32> to vector<1x128xf32>
    %49 = arith.mulf %45, %48 : vector<1x128xf32>
    %50 = arith.addf %47, %49 : vector<1x128xf32>
    %51 = math.tanh %50 : vector<1x128xf32>
    %cst_11 = arith.constant 1.000000e+00 : f32
    %52 = vector.broadcast %cst_11 : f32 to vector<1x128xf32>
    %53 = arith.subf %52, %46 : vector<1x128xf32>
    %54 = arith.mulf %53, %51 : vector<1x128xf32>
    %55 = arith.mulf %46, %33 : vector<1x128xf32>
    %56 = arith.addf %54, %55 : vector<1x128xf32>
    %cst_12 = arith.constant dense<0.000000e+00> : vector<1x384xf32>
    %57 = tpu.matmul %56, %8, %cst_12 {dimension_numbers = #tpu.dot_dimension_numbers<[1], [0], [0], [1], [0, 0, 1, 1], [], []>} : vector<1x128xf32>, vector<128x384xf32>, vector<1x384xf32> -> vector<1x384xf32>
    %58 = arith.addf %57, %9 : vector<1x384xf32>
    %59 = vector.extract_strided_slice %7 {offsets = [2, 0], sizes = [1, 384], strides = [1, 1]} : vector<8x384xf32> to vector<1x384xf32>
    %60 = vector.extract_strided_slice %59 {offsets = [0, 0], sizes = [1, 256], strides = [1, 1]} : vector<1x384xf32> to vector<1x256xf32>
    %61 = vector.extract_strided_slice %58 {offsets = [0, 0], sizes = [1, 256], strides = [1, 1]} : vector<1x384xf32> to vector<1x256xf32>
    %62 = arith.addf %60, %61 : vector<1x256xf32>
    %63 = arith.negf %62 : vector<1x256xf32>
    %64 = math.exp %63 : vector<1x256xf32>
    %cst_13 = arith.constant 1.000000e+00 : f32
    %65 = vector.broadcast %cst_13 : f32 to vector<1x256xf32>
    %66 = arith.addf %65, %64 : vector<1x256xf32>
    %67 = arith.divf %65, %66 : vector<1x256xf32>
    %68 = vector.extract_strided_slice %67 {offsets = [0, 0], sizes = [1, 128], strides = [1, 1]} : vector<1x256xf32> to vector<1x128xf32>
    %69 = vector.extract_strided_slice %67 {offsets = [0, 128], sizes = [1, 128], strides = [1, 1]} : vector<1x256xf32> to vector<1x128xf32>
    %70 = vector.extract_strided_slice %59 {offsets = [0, 256], sizes = [1, 128], strides = [1, 1]} : vector<1x384xf32> to vector<1x128xf32>
    %71 = vector.extract_strided_slice %58 {offsets = [0, 256], sizes = [1, 128], strides = [1, 1]} : vector<1x384xf32> to vector<1x128xf32>
    %72 = arith.mulf %68, %71 : vector<1x128xf32>
    %73 = arith.addf %70, %72 : vector<1x128xf32>
    %74 = math.tanh %73 : vector<1x128xf32>
    %cst_14 = arith.constant 1.000000e+00 : f32
    %75 = vector.broadcast %cst_14 : f32 to vector<1x128xf32>
    %76 = arith.subf %75, %69 : vector<1x128xf32>
    %77 = arith.mulf %76, %74 : vector<1x128xf32>
    %78 = arith.mulf %69, %56 : vector<1x128xf32>
    %79 = arith.addf %77, %78 : vector<1x128xf32>
    %cst_15 = arith.constant dense<0.000000e+00> : vector<1x384xf32>
    %80 = tpu.matmul %79, %8, %cst_15 {dimension_numbers = #tpu.dot_dimension_numbers<[1], [0], [0], [1], [0, 0, 1, 1], [], []>} : vector<1x128xf32>, vector<128x384xf32>, vector<1x384xf32> -> vector<1x384xf32>
    %81 = arith.addf %80, %9 : vector<1x384xf32>
    %82 = vector.extract_strided_slice %7 {offsets = [3, 0], sizes = [1, 384], strides = [1, 1]} : vector<8x384xf32> to vector<1x384xf32>
    %83 = vector.extract_strided_slice %82 {offsets = [0, 0], sizes = [1, 256], strides = [1, 1]} : vector<1x384xf32> to vector<1x256xf32>
    %84 = vector.extract_strided_slice %81 {offsets = [0, 0], sizes = [1, 256], strides = [1, 1]} : vector<1x384xf32> to vector<1x256xf32>
    %85 = arith.addf %83, %84 : vector<1x256xf32>
    %86 = arith.negf %85 : vector<1x256xf32>
    %87 = math.exp %86 : vector<1x256xf32>
    %cst_16 = arith.constant 1.000000e+00 : f32
    %88 = vector.broadcast %cst_16 : f32 to vector<1x256xf32>
    %89 = arith.addf %88, %87 : vector<1x256xf32>
    %90 = arith.divf %88, %89 : vector<1x256xf32>
    %91 = vector.extract_strided_slice %90 {offsets = [0, 0], sizes = [1, 128], strides = [1, 1]} : vector<1x256xf32> to vector<1x128xf32>
    %92 = vector.extract_strided_slice %90 {offsets = [0, 128], sizes = [1, 128], strides = [1, 1]} : vector<1x256xf32> to vector<1x128xf32>
    %93 = vector.extract_strided_slice %82 {offsets = [0, 256], sizes = [1, 128], strides = [1, 1]} : vector<1x384xf32> to vector<1x128xf32>
    %94 = vector.extract_strided_slice %81 {offsets = [0, 256], sizes = [1, 128], strides = [1, 1]} : vector<1x384xf32> to vector<1x128xf32>
    %95 = arith.mulf %91, %94 : vector<1x128xf32>
    %96 = arith.addf %93, %95 : vector<1x128xf32>
    %97 = math.tanh %96 : vector<1x128xf32>
    %cst_17 = arith.constant 1.000000e+00 : f32
    %98 = vector.broadcast %cst_17 : f32 to vector<1x128xf32>
    %99 = arith.subf %98, %92 : vector<1x128xf32>
    %100 = arith.mulf %99, %97 : vector<1x128xf32>
    %101 = arith.mulf %92, %79 : vector<1x128xf32>
    %102 = arith.addf %100, %101 : vector<1x128xf32>
    %cst_18 = arith.constant dense<0.000000e+00> : vector<1x384xf32>
    %103 = tpu.matmul %102, %8, %cst_18 {dimension_numbers = #tpu.dot_dimension_numbers<[1], [0], [0], [1], [0, 0, 1, 1], [], []>} : vector<1x128xf32>, vector<128x384xf32>, vector<1x384xf32> -> vector<1x384xf32>
    %104 = arith.addf %103, %9 : vector<1x384xf32>
    %105 = vector.extract_strided_slice %7 {offsets = [4, 0], sizes = [1, 384], strides = [1, 1]} : vector<8x384xf32> to vector<1x384xf32>
    %106 = vector.extract_strided_slice %105 {offsets = [0, 0], sizes = [1, 256], strides = [1, 1]} : vector<1x384xf32> to vector<1x256xf32>
    %107 = vector.extract_strided_slice %104 {offsets = [0, 0], sizes = [1, 256], strides = [1, 1]} : vector<1x384xf32> to vector<1x256xf32>
    %108 = arith.addf %106, %107 : vector<1x256xf32>
    %109 = arith.negf %108 : vector<1x256xf32>
    %110 = math.exp %109 : vector<1x256xf32>
    %cst_19 = arith.constant 1.000000e+00 : f32
    %111 = vector.broadcast %cst_19 : f32 to vector<1x256xf32>
    %112 = arith.addf %111, %110 : vector<1x256xf32>
    %113 = arith.divf %111, %112 : vector<1x256xf32>
    %114 = vector.extract_strided_slice %113 {offsets = [0, 0], sizes = [1, 128], strides = [1, 1]} : vector<1x256xf32> to vector<1x128xf32>
    %115 = vector.extract_strided_slice %113 {offsets = [0, 128], sizes = [1, 128], strides = [1, 1]} : vector<1x256xf32> to vector<1x128xf32>
    %116 = vector.extract_strided_slice %105 {offsets = [0, 256], sizes = [1, 128], strides = [1, 1]} : vector<1x384xf32> to vector<1x128xf32>
    %117 = vector.extract_strided_slice %104 {offsets = [0, 256], sizes = [1, 128], strides = [1, 1]} : vector<1x384xf32> to vector<1x128xf32>
    %118 = arith.mulf %114, %117 : vector<1x128xf32>
    %119 = arith.addf %116, %118 : vector<1x128xf32>
    %120 = math.tanh %119 : vector<1x128xf32>
    %cst_20 = arith.constant 1.000000e+00 : f32
    %121 = vector.broadcast %cst_20 : f32 to vector<1x128xf32>
    %122 = arith.subf %121, %115 : vector<1x128xf32>
    %123 = arith.mulf %122, %120 : vector<1x128xf32>
    %124 = arith.mulf %115, %102 : vector<1x128xf32>
    %125 = arith.addf %123, %124 : vector<1x128xf32>
    %cst_21 = arith.constant dense<0.000000e+00> : vector<1x384xf32>
    %126 = tpu.matmul %125, %8, %cst_21 {dimension_numbers = #tpu.dot_dimension_numbers<[1], [0], [0], [1], [0, 0, 1, 1], [], []>} : vector<1x128xf32>, vector<128x384xf32>, vector<1x384xf32> -> vector<1x384xf32>
    %127 = arith.addf %126, %9 : vector<1x384xf32>
    %128 = vector.extract_strided_slice %7 {offsets = [5, 0], sizes = [1, 384], strides = [1, 1]} : vector<8x384xf32> to vector<1x384xf32>
    %129 = vector.extract_strided_slice %128 {offsets = [0, 0], sizes = [1, 256], strides = [1, 1]} : vector<1x384xf32> to vector<1x256xf32>
    %130 = vector.extract_strided_slice %127 {offsets = [0, 0], sizes = [1, 256], strides = [1, 1]} : vector<1x384xf32> to vector<1x256xf32>
    %131 = arith.addf %129, %130 : vector<1x256xf32>
    %132 = arith.negf %131 : vector<1x256xf32>
    %133 = math.exp %132 : vector<1x256xf32>
    %cst_22 = arith.constant 1.000000e+00 : f32
    %134 = vector.broadcast %cst_22 : f32 to vector<1x256xf32>
    %135 = arith.addf %134, %133 : vector<1x256xf32>
    %136 = arith.divf %134, %135 : vector<1x256xf32>
    %137 = vector.extract_strided_slice %136 {offsets = [0, 0], sizes = [1, 128], strides = [1, 1]} : vector<1x256xf32> to vector<1x128xf32>
    %138 = vector.extract_strided_slice %136 {offsets = [0, 128], sizes = [1, 128], strides = [1, 1]} : vector<1x256xf32> to vector<1x128xf32>
    %139 = vector.extract_strided_slice %128 {offsets = [0, 256], sizes = [1, 128], strides = [1, 1]} : vector<1x384xf32> to vector<1x128xf32>
    %140 = vector.extract_strided_slice %127 {offsets = [0, 256], sizes = [1, 128], strides = [1, 1]} : vector<1x384xf32> to vector<1x128xf32>
    %141 = arith.mulf %137, %140 : vector<1x128xf32>
    %142 = arith.addf %139, %141 : vector<1x128xf32>
    %143 = math.tanh %142 : vector<1x128xf32>
    %cst_23 = arith.constant 1.000000e+00 : f32
    %144 = vector.broadcast %cst_23 : f32 to vector<1x128xf32>
    %145 = arith.subf %144, %138 : vector<1x128xf32>
    %146 = arith.mulf %145, %143 : vector<1x128xf32>
    %147 = arith.mulf %138, %125 : vector<1x128xf32>
    %148 = arith.addf %146, %147 : vector<1x128xf32>
    %cst_24 = arith.constant dense<0.000000e+00> : vector<1x384xf32>
    %149 = tpu.matmul %148, %8, %cst_24 {dimension_numbers = #tpu.dot_dimension_numbers<[1], [0], [0], [1], [0, 0, 1, 1], [], []>} : vector<1x128xf32>, vector<128x384xf32>, vector<1x384xf32> -> vector<1x384xf32>
    %150 = arith.addf %149, %9 : vector<1x384xf32>
    %151 = vector.extract_strided_slice %7 {offsets = [6, 0], sizes = [1, 384], strides = [1, 1]} : vector<8x384xf32> to vector<1x384xf32>
    %152 = vector.extract_strided_slice %151 {offsets = [0, 0], sizes = [1, 256], strides = [1, 1]} : vector<1x384xf32> to vector<1x256xf32>
    %153 = vector.extract_strided_slice %150 {offsets = [0, 0], sizes = [1, 256], strides = [1, 1]} : vector<1x384xf32> to vector<1x256xf32>
    %154 = arith.addf %152, %153 : vector<1x256xf32>
    %155 = arith.negf %154 : vector<1x256xf32>
    %156 = math.exp %155 : vector<1x256xf32>
    %cst_25 = arith.constant 1.000000e+00 : f32
    %157 = vector.broadcast %cst_25 : f32 to vector<1x256xf32>
    %158 = arith.addf %157, %156 : vector<1x256xf32>
    %159 = arith.divf %157, %158 : vector<1x256xf32>
    %160 = vector.extract_strided_slice %159 {offsets = [0, 0], sizes = [1, 128], strides = [1, 1]} : vector<1x256xf32> to vector<1x128xf32>
    %161 = vector.extract_strided_slice %159 {offsets = [0, 128], sizes = [1, 128], strides = [1, 1]} : vector<1x256xf32> to vector<1x128xf32>
    %162 = vector.extract_strided_slice %151 {offsets = [0, 256], sizes = [1, 128], strides = [1, 1]} : vector<1x384xf32> to vector<1x128xf32>
    %163 = vector.extract_strided_slice %150 {offsets = [0, 256], sizes = [1, 128], strides = [1, 1]} : vector<1x384xf32> to vector<1x128xf32>
    %164 = arith.mulf %160, %163 : vector<1x128xf32>
    %165 = arith.addf %162, %164 : vector<1x128xf32>
    %166 = math.tanh %165 : vector<1x128xf32>
    %cst_26 = arith.constant 1.000000e+00 : f32
    %167 = vector.broadcast %cst_26 : f32 to vector<1x128xf32>
    %168 = arith.subf %167, %161 : vector<1x128xf32>
    %169 = arith.mulf %168, %166 : vector<1x128xf32>
    %170 = arith.mulf %161, %148 : vector<1x128xf32>
    %171 = arith.addf %169, %170 : vector<1x128xf32>
    %cst_27 = arith.constant dense<0.000000e+00> : vector<1x384xf32>
    %172 = tpu.matmul %171, %8, %cst_27 {dimension_numbers = #tpu.dot_dimension_numbers<[1], [0], [0], [1], [0, 0, 1, 1], [], []>} : vector<1x128xf32>, vector<128x384xf32>, vector<1x384xf32> -> vector<1x384xf32>
    %173 = arith.addf %172, %9 : vector<1x384xf32>
    %174 = vector.extract_strided_slice %7 {offsets = [7, 0], sizes = [1, 384], strides = [1, 1]} : vector<8x384xf32> to vector<1x384xf32>
    %175 = vector.extract_strided_slice %174 {offsets = [0, 0], sizes = [1, 256], strides = [1, 1]} : vector<1x384xf32> to vector<1x256xf32>
    %176 = vector.extract_strided_slice %173 {offsets = [0, 0], sizes = [1, 256], strides = [1, 1]} : vector<1x384xf32> to vector<1x256xf32>
    %177 = arith.addf %175, %176 : vector<1x256xf32>
    %178 = arith.negf %177 : vector<1x256xf32>
    %179 = math.exp %178 : vector<1x256xf32>
    %cst_28 = arith.constant 1.000000e+00 : f32
    %180 = vector.broadcast %cst_28 : f32 to vector<1x256xf32>
    %181 = arith.addf %180, %179 : vector<1x256xf32>
    %182 = arith.divf %180, %181 : vector<1x256xf32>
    %183 = vector.extract_strided_slice %182 {offsets = [0, 0], sizes = [1, 128], strides = [1, 1]} : vector<1x256xf32> to vector<1x128xf32>
    %184 = vector.extract_strided_slice %182 {offsets = [0, 128], sizes = [1, 128], strides = [1, 1]} : vector<1x256xf32> to vector<1x128xf32>
    %185 = vector.extract_strided_slice %174 {offsets = [0, 256], sizes = [1, 128], strides = [1, 1]} : vector<1x384xf32> to vector<1x128xf32>
    %186 = vector.extract_strided_slice %173 {offsets = [0, 256], sizes = [1, 128], strides = [1, 1]} : vector<1x384xf32> to vector<1x128xf32>
    %187 = arith.mulf %183, %186 : vector<1x128xf32>
    %188 = arith.addf %185, %187 : vector<1x128xf32>
    %189 = math.tanh %188 : vector<1x128xf32>
    %cst_29 = arith.constant 1.000000e+00 : f32
    %190 = vector.broadcast %cst_29 : f32 to vector<1x128xf32>
    %191 = arith.subf %190, %184 : vector<1x128xf32>
    %192 = arith.mulf %191, %189 : vector<1x128xf32>
    %193 = arith.mulf %184, %171 : vector<1x128xf32>
    %194 = arith.addf %192, %193 : vector<1x128xf32>
    %c168 = arith.constant 168 : index
    %c0_30 = arith.constant 0 : index
    %195 = vector.load %arg2[%c168, %c0_30] : memref<304x384xf32, #tpu.memory_space<vmem>>, vector<128x384xf32>
    %c296 = arith.constant 296 : index
    %c0_31 = arith.constant 0 : index
    %196 = vector.load %arg2[%c296, %c0_31] : memref<304x384xf32, #tpu.memory_space<vmem>>, vector<1x384xf32>
    %cst_32 = arith.constant dense<0.000000e+00> : vector<1x384xf32>
    %197 = tpu.matmul %194, %195, %cst_32 {dimension_numbers = #tpu.dot_dimension_numbers<[1], [0], [0], [1], [0, 0, 1, 1], [], []>} : vector<1x128xf32>, vector<128x384xf32>, vector<1x384xf32> -> vector<1x384xf32>
    %198 = arith.addf %197, %196 : vector<1x384xf32>
    %199 = vector.extract_strided_slice %198 {offsets = [0, 0], sizes = [1, 8], strides = [1, 1]} : vector<1x384xf32> to vector<1x8xf32>
    %cst_33 = arith.constant 0.000000e+00 : f32
    %200 = vector.broadcast %cst_33 : f32 to vector<1x8xf32>
    %201 = arith.maximumf %199, %200 : vector<1x8xf32>
    %cst_34 = arith.constant dense<0xFF800000> : vector<1xf32>
    %202 = vector.multi_reduction <maximumf>, %201, %cst_34 [1] : vector<1x8xf32> to vector<1xf32>
    %203 = vector.shape_cast %202 : vector<1xf32> to vector<1x1xf32>
    %204 = vector.broadcast %203 : vector<1x1xf32> to vector<1x8xf32>
    %205 = arith.subf %201, %204 : vector<1x8xf32>
    %206 = math.exp %205 : vector<1x8xf32>
    %cst_35 = arith.constant dense<0.000000e+00> : vector<1xf32>
    %207 = vector.multi_reduction <add>, %206, %cst_35 [1] : vector<1x8xf32> to vector<1xf32>
    %208 = vector.shape_cast %207 : vector<1xf32> to vector<1x1xf32>
    %209 = math.log %208 : vector<1x1xf32>
    %210 = arith.addf %209, %203 : vector<1x1xf32>
    %211 = vector.broadcast %210 : vector<1x1xf32> to vector<1x8xf32>
    %212 = arith.subf %201, %211 : vector<1x8xf32>
    %c0_36 = arith.constant 0 : index
    %c0_37 = arith.constant 0 : index
    %213 = vector.load %arg3[%c0_36, %c0_37] : memref<1x8xf32, #tpu.memory_space<vmem>>, vector<1x8xf32>
    tpu.vector_store %arg3[%c0_36, %c0_37], %212 {strides = array<i32>} : memref<1x8xf32, #tpu.memory_space<vmem>>, vector<1x8xf32>,
    return
  }
  func.func @transform_0(%arg0: i32) -> (i32, i32) {
    %c0_i32 = arith.constant 0 : i32
    %c0_i32_0 = arith.constant 0 : i32
    %c0_i32_1 = arith.constant 0 : i32
    return %c0_i32, %c0_i32_0 : i32, i32
  }
  func.func @transform_1(%arg0: i32) -> (i32, i32) {
    %c0_i32 = arith.constant 0 : i32
    %c0_i32_0 = arith.constant 0 : i32
    %c0_i32_1 = arith.constant 0 : i32
    return %c0_i32, %c0_i32_0 : i32, i32
  }
  func.func @transform_2(%arg0: i32) -> (i32, i32) {
    %c0_i32 = arith.constant 0 : i32
    %c0_i32_0 = arith.constant 0 : i32
    %c0_i32_1 = arith.constant 0 : i32
    return %c0_i32, %c0_i32_0 : i32, i32
  }
}

</mosaic_0001>

<bundles_post_ra>
// kernel: forward.1
= control target key start
LH: loop header
LB: loop body
LE: loop exit
PB: predicated region body
PF: predicated region fallthrough
CT: control target
= control target key end

     0   :  { %7 = vsyncpa [#allocation3], 0  ;;  %s3304_s0 = inlined_call_operand.vmem [shape: s32[8,1], index: 0, kind: input, shape index: {}]   ;;  %s3305_s1 = inlined_call_operand.hbm [shape: f32[304,384], index: 1, kind: input, shape index: {}]   ;;  %s3306_s2 = inlined_call_operand.hbm [shape: f32[1,8], index: 2, kind: output, shape index: {}]  }
   0x1   :  { %8 = vsyncpa [#allocation4], 0  ;;  %s2429_s9 = smov [#allocation2]  }
   0x2   :  { %s16_s10 = sshll.u32 %s2429_s9, 4  ;;  %s17_s10 = int_to_ptr.vmem [resolvable:$true] %s16_s10 }
   0x3   :  { %s2393_s11 = scalar_lea.vmem %s17_s10, 14592  ;;  %p2398_p1 = scmp.lt.s32.totalorder %s17_s10, %s17_s10 }
   0x4   :  { %p2394_p0 = scmp.ne.s32.totalorder %s17_s10, %s2393_s11  ;;  %p2399_p2 = scmp.lt.s32.totalorder %s2393_s11, %s2393_s11 }
   0x6   :  { %p2400_p3 = por %p2399_p2, %p2398_p1 }
   0x8   :  { %p2401_p4 = pnand %p2400_p3, %p2394_p0 }
   0xa   :  { %2404 = shalt.err (!%p2401_p4)
}
   0xb   :  { %s2430_s12 = smov 384   ;;  %s2431_s13 = smov 24  }
   0xc   :  { %22 = dma.hbm_to_vmem [thread:$0]  %s3305_s1, 14592, %s17_s10, [#allocation3], %s2430_s12, %s2430_s12, %s2431_s13  }
   0xd   :  { %2425 = dma.done.wait [#allocation3], 14592  }
   0xe   :  { %2426 = vsyncadd [#allocation3], 4294952704  ;;  %v2432_v0 = vmov 0   ;;  %v3308_v1 = vmov 0.0   ;;  %v26_v2 = vld [vmem:[%s3304_s0] sm:$0xff]  ;;  %v2459_v3 = vld [vmem:[#allocation2 + $0x1d0] sm:$0xff]  ;;  %v27_v43 = vlaneseq }
   0xf   :  { %2252 = vset.pattern.permute.xlu0 %v2432_v0  ;;  %322 = vmatprep.mubr.f32.mxu0 %v3308_v1  ;;  %3339 = vst [vmem:[#allocation8_spill] sm:$0xff] %v2459_v3  ;;  %v2461_v4 = vld [vmem:[#allocation2 + $0x1c8] sm:$0xff]  ;;  %v2464_v5 = vld [vmem:[#allocation2 + $0x1b8] sm:$0xff]  ;;  %v2466_v6 = vld [vmem:[#allocation2 + $0x1b0] sm:$0xff]  ;;  %vm47_vm0 = vcmask 261120   ;;  %vm2434_vm2 = vmmov 0  }
  0x10   :  { %115 = vmatprep.mubr.f32.mxu1 %v3308_v1  ;;  %30 = vperm.xlu0 %2252, %v26_v2   ;;  %v2469_v7 = vld [vmem:[#allocation2 + $0x1a0] sm:$0xff]  ;;  %v2472_v8 = vld [vmem:[#allocation2 + $0x198] sm:$0xff]  ;;  %v2475_v9 = vld [vmem:[#allocation2 + $0x188] sm:$0xff]  ;;  %v28_v44 = vand.u32 127, %v27_v43  ;;  %vm1764_vm3 = vcmask 57344   ;;  %s2435_s0 = smov [#allocation5]  }
  0x11   :  { %258 = vmatprep.subr.mxu0 %v2459_v3  ;;  %v2478_v10 = vld [vmem:[#allocation2 + $0x180] sm:$0xff]  ;;  %v2481_v11 = vld [vmem:[#allocation2 + $0x170] sm:$0xff]  ;;  %v2484_v12 = vld [vmem:[#allocation2 + $0x168] sm:$0xff]  ;;  %s1785_s1 = sshll.u32 %s2435_s0, 4  ;;  %s1786_s1 = int_to_ptr.vmem [resolvable:$true] %s1785_s1 }
  0x12   :  { %259 = vmatpush1.msra.mxu0 %v2461_v4  ;;  %v2487_v13 = vld [vmem:[#allocation2 + $0x158] sm:$0xff]  ;;  %v45_v14 = vld [vmem:[#allocation2 + $0x50] sm:$0xff]  ;;  %v44_v16 = vld [vmem:[#allocation2 + $0x48] sm:$0xff]  ;;  %s2405_s18 = scalar_lea.vmem %s1786_s1, 16  ;;  %s2409_s19 = scalar_lea.vmem %s1786_s1, 32 }
  0x13   :  { %260 = vmatprep.subr.mxu0 %v2464_v5  ;;  %v2490_v15 = vld [vmem:[#allocation2 + $0x150] sm:$0xff]  ;;  %75 = vmatprep.subr.mxu1 %v45_v14  ;;  %v2493_v17 = vld [vmem:[#allocation2 + $0x140] sm:$0xff]  ;;  %v42_v18 = vld [vmem:[#allocation2 + $0x38] sm:$0xff]  ;;  %p2406_p5 = scmp.ne.s32.totalorder %s1786_s1, %s2405_s18  ;;  %p2410_p6 = scmp.lt.s32.totalorder %s1786_s1, %s1786_s1 }
  0x14   :  { %261 = vmatpush1.msra.mxu0 %v2466_v6  ;;  %76 = vmatpush1.msra.mxu1 %v44_v16  ;;  %v41_v19 = vld [vmem:[#allocation2 + $0x30] sm:$0xff]  ;;  %v2496_v20 = vld [vmem:[#allocation2 + $0x138] sm:$0xff]  ;;  %v39_v21 = vld [vmem:[#allocation2 + $0x20] sm:$0xff]  ;;  %v2703_v16 = vshrl.u32 %v27_v43, 7  ;;  %p2411_p7 = scmp.lt.s32.totalorder %s2409_s19, %s2405_s18 }
  0x15   :  { %262 = vmatprep.subr.mxu0 %v2469_v7  ;;  %77 = vmatprep.subr.mxu1 %v42_v18  ;;  %v2499_v22 = vld [vmem:[#allocation2 + $0x128] sm:$0xff]  ;;  %v38_v23 = vld [vmem:[#allocation2 + $0x18] sm:$0xff]  ;;  %v2502_v25 = vld [vmem:[#allocation2 + $0x120] sm:$0xff] }
  0x16   :  { %263 = vmatpush1.msra.mxu0 %v2472_v8  ;;  %78 = vmatpush1.msra.mxu1 %v41_v19  ;;  %v36_v24 = vld [vmem:[#allocation2 + $0x8] sm:$0xff]  ;;  %v35_v26 = vld [vmem:[#allocation2] sm:$0xff]  ;;  %v2505_v27 = vld [vmem:[#allocation2 + $0x110] sm:$0xff]  ;;  %3347 = vst [vmem:[#allocation16_spill] sm:$0xff] %v2703_v16  ;;  %v3307_v18 = vsub.s32 0, %v2703_v16  ;;  %p2412_p8 = por %p2411_p7, %p2410_p6 }
  0x17   :  { %264 = vmatprep.subr.mxu0 %v2475_v9  ;;  %79 = vmatprep.subr.mxu1 %v39_v21  ;;  %v2508_v28 = vld [vmem:[#allocation2 + $0x108] sm:$0xff]  ;;  %v2511_v29 = vld [vmem:[#allocation2 + $0xf8] sm:$0xff]  ;;  %v2514_v30 = vld [vmem:[#allocation2 + $0xf0] sm:$0xff] }
  0x18   :  { %265 = vmatpush1.msra.mxu0 %v2478_v10  ;;  %80 = vmatpush1.msra.mxu1 %v38_v23  ;;  %v2518_v31 = vld [vmem:[#allocation2 + $0xe0] sm:$0xff]  ;;  %v2521_v32 = vld [vmem:[#allocation2 + $0xd8] sm:$0xff]  ;;  %v2524_v33 = vld [vmem:[#allocation2 + $0xc8] sm:$0xff]  ;;  %p2413_p9 = pnand %p2412_p8, %p2406_p5 }
  0x19   :  { %266 = vmatprep.subr.mxu0 %v2481_v11  ;;  %81 = vmatprep.subr.mxu1 %v36_v24  ;;  %v2527_v34 = vld [vmem:[#allocation2 + $0xc0] sm:$0xff]  ;;  %v2530_v35 = vld [vmem:[#allocation2 + $0xb0] sm:$0xff]  ;;  %v2533_v36 = vld [vmem:[#allocation2 + $0xa8] sm:$0xff] }
  0x1a   :  { %267 = vmatpush1.msra.mxu0 %v2484_v12  ;;  %82 = vmatpush1.msra.mxu1 %v35_v26  ;;  %v2536_v37 = vld [vmem:[#allocation2 + $0x98] sm:$0xff]  ;;  %v2539_v38 = vld [vmem:[#allocation2 + $0x90] sm:$0xff]  ;;  %v2542_v39 = vld [vmem:[#allocation2 + $0x80] sm:$0xff] }
  0x1b   :  { %268 = vmatprep.subr.mxu0 %v2487_v13  ;;  %1954 = vmatprep.subr.mxu1 %v3308_v1  ;;  %3340 = vst [vmem:[#allocation9_spill] sm:$0xff] %v2542_v39  ;;  %v2545_v40 = vld [vmem:[#allocation2 + $0x78] sm:$0xff]  ;;  %v2548_v41 = vld [vmem:[#allocation2 + $0x68] sm:$0xff]  ;;  %v2551_v42 = vld [vmem:[#allocation2 + $0x60] sm:$0xff] }
  0x1c   :  { %269 = vmatpush1.msra.mxu0 %v2490_v15  ;;  %3341 = vst [vmem:[#allocation10_spill] sm:$0xff] %v2545_v40  ;;  %3342 = vst [vmem:[#allocation11_spill] sm:$0xff] %v2548_v41  ;;  %v46_v46 = vld [vmem:[#allocation2 + $0x58] sm:$0xff]  ;;  %v43_v48 = vld [vmem:[#allocation2 + $0x40] sm:$0xff] }
  0x1d   :  { %270 = vmatprep.subr.mxu0 %v2493_v17  ;;  %3343 = vst [vmem:[#allocation12_spill] sm:$0xff] %v2551_v42  ;;  %v40_v49 = vld [vmem:[#allocation2 + $0x28] sm:$0xff]  ;;  %v37_v50 = vld [vmem:[#allocation2 + $0x10] sm:$0xff]  ;;  %v2599_v51 = vld [vmem:[#allocation2 + $0x1d8] sm:$0xff] }
  0x1e   :  { %271 = vmatpush1.msra.mxu0 %v2496_v20  ;;  %v2603_v52 = vld [vmem:[#allocation2 + $0x1c0] sm:$0xff]  ;;  %v2609_v53 = vld [vmem:[#allocation2 + $0x1a8] sm:$0xff]  ;;  %v2613_v54 = vld [vmem:[#allocation2 + $0x190] sm:$0xff] }
  0x1f   :  { %272 = vmatprep.subr.mxu0 %v2499_v22  ;;  %v2617_v55 = vld [vmem:[#allocation2 + $0x178] sm:$0xff]  ;;  %v2621_v56 = vld [vmem:[#allocation2 + $0x160] sm:$0xff]  ;;  %v2625_v57 = vld [vmem:[#allocation2 + $0x148] sm:$0xff] }
  0x20   :  { %273 = vmatpush1.msra.mxu0 %v2502_v25  ;;  %v2629_v58 = vld [vmem:[#allocation2 + $0x130] sm:$0xff]  ;;  %v2633_v59 = vld [vmem:[#allocation2 + $0x118] sm:$0xff]  ;;  %v2637_v60 = vld [vmem:[#allocation2 + $0x100] sm:$0xff] }
  0x21   :  { %274 = vmatprep.subr.mxu0 %v2505_v27  ;;  %v2641_v61 = vld [vmem:[#allocation2 + $0xe8] sm:$0xff]  ;;  %v2645_v62 = vld [vmem:[#allocation2 + $0xd0] sm:$0xff]  ;;  %v2649_v63 = vld [vmem:[#allocation2 + $0xb8] sm:$0xff] }
  0x22   :  { %275 = vmatpush1.msra.mxu0 %v2508_v28  ;;  %v2653_v0 = vld [vmem:[#allocation2 + $0xa0] sm:$0xff]  ;;  %v2657_v2 = vld [vmem:[#allocation2 + $0x88] sm:$0xff]  ;;  %v2661_v14 = vld [vmem:[#allocation2 + $0x70] sm:$0xff] }
  0x23   :  { %276 = vmatprep.subr.mxu0 %v2511_v29  ;;  %3344 = vst [vmem:[#allocation13_spill] sm:$0xff] %v2653_v0  ;;  %3345 = vst [vmem:[#allocation14_spill] sm:$0xff] %v2657_v2  ;;  %v241_v19 = vld [vmem:[#allocation2 + $0x1e0] ss:$8 sm:$0x7] }
  0x24   :  { %277 = vmatpush1.msra.mxu0 %v2514_v30  ;;  %3346 = vst [vmem:[#allocation15_spill] sm:$0xff] %v2661_v14  ;;  %v2708_v21 = vrot.slane %v241_v19, %v3307_v18 }
  0x25   :  { %278 = vmatprep.subr.mxu0 %v2518_v31 }
  0x26   :  { %279 = vmatpush1.msra.mxu0 %v2521_v32  ;;  %3348 = vst [vmem:[#allocation17_spill] sm:$0xff] %v2708_v21 }
  0x27   :  { %280 = vmatprep.subr.mxu0 %v2524_v33 }
  0x28   :  { %281 = vmatpush1.msra.mxu0 %v2527_v34 }
  0x29   :  { %282 = vmatprep.subr.mxu0 %v2530_v35 }
  0x2a   :  { %283 = vmatpush1.msra.mxu0 %v2533_v36 }
  0x2b   :  { %284 = vmatprep.subr.mxu0 %v2536_v37 }
  0x2c   :  { %285 = vmatpush1.msra.mxu0 %v2539_v38 }
  0x2d   :  { %286 = vmatprep.subr.mxu0 %v2542_v39 }
  0x2e   :  { %287 = vmatpush1.msra.mxu0 %v2545_v40 }
  0x2f   :  { %288 = vmatprep.subr.mxu0 %v2548_v41 }
  0x30   :  { %289 = vmatpush1.msra.mxu0 %v2551_v42 }
  0x31   :  { %323 = vmatmul.mubr.f32.vlgmr.msra.gmra.mxu0 %v3308_v1  ;;  %420 = vmatprep.subr.mxu0 %v2459_v3 }
  0x32   :  { %421 = vmatpush1.msra.mxu0 %v2461_v4  ;;  %484 = vmatprep.mubr.f32.mxu0 %v3308_v1 }
  0x33   :  { %422 = vmatprep.subr.mxu0 %v2464_v5 }
  0x34   :  { %423 = vmatpush1.msra.mxu0 %v2466_v6 }
  0x35   :  { %424 = vmatprep.subr.mxu0 %v2469_v7 }
  0x36   :  { %425 = vmatpush1.msra.mxu0 %v2472_v8 }
  0x37   :  { %426 = vmatprep.subr.mxu0 %v2475_v9 }
  0x38   :  { %427 = vmatpush1.msra.mxu0 %v2478_v10 }
  0x39   :  { %428 = vmatprep.subr.mxu0 %v2481_v11 }
  0x3a   :  { %429 = vmatpush1.msra.mxu0 %v2484_v12 }
  0x3b   :  { %430 = vmatprep.subr.mxu0 %v2487_v13 }
  0x3c   :  { %431 = vmatpush1.msra.mxu0 %v2490_v15 }
  0x3d   :  { %432 = vmatprep.subr.mxu0 %v2493_v17 }
  0x3e   :  { %433 = vmatpush1.msra.mxu0 %v2496_v20 }
  0x3f   :  { %434 = vmatprep.subr.mxu0 %v2499_v22 }
  0x40   :  { %435 = vmatpush1.msra.mxu0 %v2502_v25 }
  0x41   :  { %436 = vmatprep.subr.mxu0 %v2505_v27 }
  0x42   :  { %437 = vmatpush1.msra.mxu0 %v2508_v28 }
  0x43   :  { %438 = vmatprep.subr.mxu0 %v2511_v29 }
  0x44   :  { %439 = vmatpush1.msra.mxu0 %v2514_v30 }
  0x45   :  { %440 = vmatprep.subr.mxu0 %v2518_v31 }
  0x46   :  { %441 = vmatpush1.msra.mxu0 %v2521_v32 }
  0x47   :  { %442 = vmatprep.subr.mxu0 %v2524_v33 }
  0x48   :  { %443 = vmatpush1.msra.mxu0 %v2527_v34 }
  0x49   :  { %444 = vmatprep.subr.mxu0 %v2530_v35 }
  0x4a   :  { %445 = vmatpush1.msra.mxu0 %v2533_v36 }
  0x4b   :  { %446 = vmatprep.subr.mxu0 %v2536_v37 }
  0x4c   :  { %447 = vmatpush1.msra.mxu0 %v2539_v38 }
  0x4d   :  { %448 = vmatprep.subr.mxu0 %v2542_v39 }
  0x4e   :  { %449 = vmatpush1.msra.mxu0 %v2545_v40 }
  0x4f   :  { %450 = vmatprep.subr.mxu0 %v2548_v41 }
  0x50   :  { %451 = vmatpush1.msra.mxu0 %v2551_v42 }
  0x51   :  { %597 = vmatprep.subr.mxu0 %v2459_v3 }
  0x8b   :  { %v31_v45 = vpop.permute.xlu0 %30 }
  0x8c   :  { %vm32_vm1 = vcmp.eq.s32.totalorder %v28_v44, %v31_v45  ;;  %v249_v45 = vsub.s32 1, %v2703_v16 }
  0x8d   :  { %v1794_v47 = vsel %vm32_vm1, 1.0, %v3308_v1 }
  0x8e   :  { %1795 = vmatmul.mubr.msk.f32.vlgmr.msra.gmra.mxu1 %vm47_vm0, %v1794_v47  ;;  %v2717_v43 = vrot.slane %v241_v19, %v249_v45 }
  0x8f   :  { %1955 = vmatpush3.msra.mxu1 %v46_v46  ;;  %1962 = vmatprep.mubr.msk.f32.mxu1 %vm2434_vm2, %v3308_v1 }
  0x90   :  { %1956 = vmatprep.subr.mxu1 %v3308_v1 }
  0x91   :  { %1957 = vmatpush3.msra.mxu1 %v43_v48 }
  0x92   :  { %1958 = vmatprep.subr.mxu1 %v3308_v1 }
  0x93   :  { %1959 = vmatpush3.msra.mxu1 %v40_v49 }
  0x94   :  { %1960 = vmatprep.subr.mxu1 %v3308_v1 }
  0x95   :  { %1961 = vmatpush3.msra.mxu1 %v37_v50 }
  0x96   :  { %1963 = vmatmul.mubr.msk.f32.vlgmr.msra.gmra.mxu1 %vm47_vm0, %v1794_v47  ;;  %1965 = vmatprep.subr.mxu1 %v3308_v1 }
  0x97   :  { %1966 = vmatpush3.msra.mxu1 %v2599_v51  ;;  %1997 = vmatprep.mubr.msk.f32.mxu1 %vm2434_vm2, %v3308_v1 }
  0x98   :  { %1967 = vmatprep.subr.mxu1 %v3308_v1 }
  0x99   :  { %1968 = vmatpush3.msra.mxu1 %v2603_v52 }
  0x9a   :  { %1969 = vmatprep.subr.mxu1 %v3308_v1 }
  0x9b   :  { %1970 = vmatpush3.msra.mxu1 %v2609_v53 }
  0x9c   :  { %1971 = vmatprep.subr.mxu1 %v3308_v1 }
  0x9d   :  { %1972 = vmatpush3.msra.mxu1 %v2613_v54 }
  0x9e   :  { %1973 = vmatprep.subr.mxu1 %v3308_v1 }
  0x9f   :  { %1974 = vmatpush3.msra.mxu1 %v2617_v55 }
  0xa0   :  { %1975 = vmatprep.subr.mxu1 %v3308_v1 }
  0xa1   :  { %1976 = vmatpush3.msra.mxu1 %v2621_v56 }
  0xa2   :  { %1977 = vmatprep.subr.mxu1 %v3308_v1 }
  0xa3   :  { %1978 = vmatpush3.msra.mxu1 %v2625_v57 }
  0xa4   :  { %1979 = vmatprep.subr.mxu1 %v3308_v1 }
  0xa5   :  { %1980 = vmatpush3.msra.mxu1 %v2629_v58 }
  0xa6   :  { %1981 = vmatprep.subr.mxu1 %v3308_v1 }
  0xa7   :  { %1982 = vmatpush3.msra.mxu1 %v2633_v59 }
  0xa8   :  { %1983 = vmatprep.subr.mxu1 %v3308_v1 }
  0xa9   :  { %1984 = vmatpush3.msra.mxu1 %v2637_v60 }
  0xaa   :  { %1985 = vmatprep.subr.mxu1 %v3308_v1 }
  0xab   :  { %1986 = vmatpush3.msra.mxu1 %v2641_v61 }
  0xac   :  { %1987 = vmatprep.subr.mxu1 %v3308_v1 }
  0xad   :  { %1988 = vmatpush3.msra.mxu1 %v2645_v62 }
  0xae   :  { %1989 = vmatprep.subr.mxu1 %v3308_v1 }
  0xaf   :  { %1990 = vmatpush3.msra.mxu1 %v2649_v63 }
  0xb0   :  { %1991 = vmatprep.subr.mxu1 %v3308_v1 }
  0xb1   :  { %1992 = vmatpush3.msra.mxu1 %v2653_v0 }
  0xb2   :  { %1993 = vmatprep.subr.mxu1 %v3308_v1 }
  0xb3   :  { %1994 = vmatpush3.msra.mxu1 %v2657_v2 }
  0xb4   :  { %1995 = vmatprep.subr.mxu1 %v3308_v1 }
  0xb5   :  { %1996 = vmatpush3.msra.mxu1 %v2661_v14 }
  0xb6   :  { %1998 = vmatmul.mubr.f32.vlgmr.msra.gmra.mxu1 %v3308_v1  ;;  %2000 = vmatprep.subr.mxu1 %v3308_v1 }
  0xb7   :  { %2001 = vmatpush3.msra.mxu1 %v2599_v51  ;;  %2032 = vmatprep.mubr.msk.f32.mxu1 %vm2434_vm2, %v3308_v1 }
  0xb8   :  { %2002 = vmatprep.subr.mxu1 %v3308_v1 }
  0xb9   :  { %2003 = vmatpush3.msra.mxu1 %v2603_v52 }
  0xba   :  { %2004 = vmatprep.subr.mxu1 %v3308_v1 }
  0xbb   :  { %2005 = vmatpush3.msra.mxu1 %v2609_v53 }
  0xbc   :  { %2006 = vmatprep.subr.mxu1 %v3308_v1 }
  0xbd   :  { %2007 = vmatpush3.msra.mxu1 %v2613_v54 }
  0xbe   :  { %2008 = vmatprep.subr.mxu1 %v3308_v1 }
  0xbf   :  { %2009 = vmatpush3.msra.mxu1 %v2617_v55 }
  0xc0   :  { %2010 = vmatprep.subr.mxu1 %v3308_v1 }
  0xc1   :  { %2011 = vmatpush3.msra.mxu1 %v2621_v56 }
  0xc2   :  { %2012 = vmatprep.subr.mxu1 %v3308_v1 }
  0xc3   :  { %2013 = vmatpush3.msra.mxu1 %v2625_v57 }
  0xc4   :  { %2014 = vmatprep.subr.mxu1 %v3308_v1 }
  0xc5   :  { %2015 = vmatpush3.msra.mxu1 %v2629_v58 }
  0xc6   :  { %2016 = vmatprep.subr.mxu1 %v3308_v1 }
  0xc7   :  { %2017 = vmatpush3.msra.mxu1 %v2633_v59 }
  0xc8   :  { %2018 = vmatprep.subr.mxu1 %v3308_v1 }
  0xc9   :  { %2019 = vmatpush3.msra.mxu1 %v2637_v60 }
  0xca   :  { %2020 = vmatprep.subr.mxu1 %v3308_v1 }
  0xcb   :  { %2021 = vmatpush3.msra.mxu1 %v2641_v61 }
  0xcc   :  { %2022 = vmatprep.subr.mxu1 %v3308_v1 }
  0xcd   :  { %2023 = vmatpush3.msra.mxu1 %v2645_v62 }
  0xce   :  { %2024 = vmatprep.subr.mxu1 %v3308_v1 }
  0xcf   :  { %2025 = vmatpush3.msra.mxu1 %v2649_v63 }
  0xd0   :  { %2026 = vmatprep.subr.mxu1 %v3308_v1 }
  0xd1   :  { %2027 = vmatpush3.msra.mxu1 %v2653_v0 }
  0xd2   :  { %2028 = vmatprep.subr.mxu1 %v3308_v1 }
  0xd3   :  { %2029 = vmatpush3.msra.mxu1 %v2657_v2 }
  0xd4   :  { %2030 = vmatprep.subr.mxu1 %v3308_v1 }
  0xd5   :  { %2031 = vmatpush3.msra.mxu1 %v2661_v14 }
  0xd6   :  { %2035 = vmatprep.subr.mxu1 %v3308_v1 }
  0xf1   :  { %v324_v23 = vpop.f32.mrf.mxu0 }
  0xf2   :  { %v325_v24 = vadd.f32 %v324_v23, %v2708_v21 }
  0xf3   :  { %v326_v48 = vpop.f32.mrf.mxu0 }
  0xf4   :  { %v327_v18 = vadd.f32 %v326_v48, %v2717_v43 }
 0x14e   :  { %v2711_v26 = vpop.f32.mrf.mxu1 }
 0x14f   :  { %3349 = vst [vmem:[#allocation18_spill] sm:$0xff] %v2711_v26  ;;  %v399_v44 = vadd.f32 %v325_v24, %v2711_v26 }
 0x150   :  { %v2715_v47 = vpop.f32.mrf.mxu1 }
 0x151   :  { %v1797_v46 = vmul.f32 -1.442695, %v399_v44  ;;  %v400_v23 = vadd.f32 %v327_v18, %v2715_v47  ;;  %v253_v44 = vsub.s32 2, %v2703_v16 }
 0x153   :  { %2253 = vpow2.f32 %v1797_v46  ;;  %v1798_v1 = vmul.f32 -1.442695, %v400_v23  ;;  %v2724_v3 = vrot.slane %v241_v19, %v253_v44  ;;  %v3353_v19 = vld [vmem:[#allocation15_spill] sm:$0xff] }
 0x155   :  { %2255 = vpow2.f32 %v1798_v1 }
 0x156   :  { %v2719_v49 = vpop.f32.mrf.mxu1 }
 0x158   :  { %v1964_v50 = vpop.f32.mrf.mxu1 }
 0x160   :  { %v2254_v21 = vpop.eup %2253 }
 0x161   :  { %v407_v24 = vadd.f32 1.0, %v2254_v21 }
 0x162   :  { %v2256_v26 = vpop.eup %2255 }
 0x163   :  { %2257 = vrcp.f32 %v407_v24  ;;  %v408_v45 = vadd.f32 1.0, %v2256_v26  ;;  %v3354_v26 = vld [vmem:[#allocation8_spill] sm:$0xff] }
 0x165   :  { %2259 = vrcp.f32 %v408_v45 }
 0x170   :  { %v2258_v46 = vpop.eup %2257 }
 0x172   :  { %v2260_v48 = vpop.eup %2259 }
 0x173   :  { %v416_v1 = vsub.f32 1.0, %v2260_v48  ;;  %v418_v24 = vmul.f32 0.0, %v2260_v48 }
 0x176   :  { %v395_v14 = vpop.f32.mrf.mxu1 }
 0x177   :  { %v396_v42 = vadd.f32 %v395_v14, %v2724_v3  ;;  %v3352_v14 = vld [vmem:[#allocation12_spill] sm:$0xff] }
 0x178   :  { %v1999_v50 = vpop.f32.mrf.mxu1 }
 0x179   :  { %v413_v41 = vmul.f32 %v2258_v46, %v396_v42  ;;  %v3350_v42 = vmov 0.0   ;;  %v3355_v46 = vld [vmem:[#allocation17_spill] sm:$0xff] }
 0x17b   :  { %v414_v18 = vadd.f32 %v413_v41, %v2719_v49  ;;  %v3351_v41 = vld [vmem:[#allocation11_spill] sm:$0xff] }
 0x17d   :  { %2261 = vtanh.f32 %v414_v18 }
 0x18a   :  { %v2262_v21 = vpop.eup %2261 }
 0x18b   :  { %v417_v23 = vmul.f32 %v2262_v21, %v416_v1 }
 0x18d   :  { %v2728_v16 = vadd.f32 %v418_v24, %v417_v23  ;;  %v3356_v23 = vld [vmem:[#allocation18_spill] sm:$0xff] }
 0x18f   :  { %485 = vmatmul.mubr.f32.vlgmr.msra.gmra.mxu0 %v2728_v16  ;;  %2033 = vmatmul.mubr.f32.vlgmr.msra.gmra.mxu1 %v2728_v16 }
 0x190   :  { %598 = vmatpush1.msra.mxu0 %v2461_v4  ;;  %2036 = vmatpush3.msra.mxu1 %v2599_v51 }
 0x191   :  { %599 = vmatprep.subr.mxu0 %v2464_v5  ;;  %2037 = vmatprep.subr.mxu1 %v3350_v42 }
 0x192   :  { %600 = vmatpush1.msra.mxu0 %v2466_v6  ;;  %2038 = vmatpush3.msra.mxu1 %v2603_v52 }
 0x193   :  { %601 = vmatprep.subr.mxu0 %v2469_v7  ;;  %2039 = vmatprep.subr.mxu1 %v3350_v42 }
 0x194   :  { %602 = vmatpush1.msra.mxu0 %v2472_v8  ;;  %2040 = vmatpush3.msra.mxu1 %v2609_v53 }
 0x195   :  { %603 = vmatprep.subr.mxu0 %v2475_v9  ;;  %2041 = vmatprep.subr.mxu1 %v3350_v42 }
 0x196   :  { %604 = vmatpush1.msra.mxu0 %v2478_v10  ;;  %2042 = vmatpush3.msra.mxu1 %v2613_v54 }
 0x197   :  { %605 = vmatprep.subr.mxu0 %v2481_v11  ;;  %2043 = vmatprep.subr.mxu1 %v3350_v42 }
 0x198   :  { %606 = vmatpush1.msra.mxu0 %v2484_v12  ;;  %2044 = vmatpush3.msra.mxu1 %v2617_v55 }
 0x199   :  { %607 = vmatprep.subr.mxu0 %v2487_v13  ;;  %2045 = vmatprep.subr.mxu1 %v3350_v42 }
 0x19a   :  { %608 = vmatpush1.msra.mxu0 %v2490_v15  ;;  %2046 = vmatpush3.msra.mxu1 %v2621_v56 }
 0x19b   :  { %609 = vmatprep.subr.mxu0 %v2493_v17  ;;  %2047 = vmatprep.subr.mxu1 %v3350_v42 }
 0x19c   :  { %610 = vmatpush1.msra.mxu0 %v2496_v20  ;;  %2048 = vmatpush3.msra.mxu1 %v2625_v57 }
 0x19d   :  { %611 = vmatprep.subr.mxu0 %v2499_v22  ;;  %2049 = vmatprep.subr.mxu1 %v3350_v42 }
 0x19e   :  { %612 = vmatpush1.msra.mxu0 %v2502_v25  ;;  %2050 = vmatpush3.msra.mxu1 %v2629_v58 }
 0x19f   :  { %613 = vmatprep.subr.mxu0 %v2505_v27  ;;  %2051 = vmatprep.subr.mxu1 %v3350_v42 }
 0x1a0   :  { %614 = vmatpush1.msra.mxu0 %v2508_v28  ;;  %2052 = vmatpush3.msra.mxu1 %v2633_v59 }
 0x1a1   :  { %615 = vmatprep.subr.mxu0 %v2511_v29  ;;  %2053 = vmatprep.subr.mxu1 %v3350_v42 }
 0x1a2   :  { %616 = vmatpush1.msra.mxu0 %v2514_v30  ;;  %2054 = vmatpush3.msra.mxu1 %v2637_v60 }
 0x1a3   :  { %617 = vmatprep.subr.mxu0 %v2518_v31  ;;  %2055 = vmatprep.subr.mxu1 %v3350_v42 }
 0x1a4   :  { %618 = vmatpush1.msra.mxu0 %v2521_v32  ;;  %2056 = vmatpush3.msra.mxu1 %v2641_v61 }
 0x1a5   :  { %619 = vmatprep.subr.mxu0 %v2524_v33  ;;  %2057 = vmatprep.subr.mxu1 %v3350_v42 }
 0x1a6   :  { %620 = vmatpush1.msra.mxu0 %v2527_v34  ;;  %2058 = vmatpush3.msra.mxu1 %v2645_v62 }
 0x1a7   :  { %621 = vmatprep.subr.mxu0 %v2530_v35  ;;  %2059 = vmatprep.subr.mxu1 %v3350_v42 }
 0x1a8   :  { %622 = vmatpush1.msra.mxu0 %v2533_v36  ;;  %2060 = vmatpush3.msra.mxu1 %v2649_v63 }
 0x1a9   :  { %623 = vmatprep.subr.mxu0 %v2536_v37  ;;  %2061 = vmatprep.subr.mxu1 %v3350_v42 }
 0x1aa   :  { %624 = vmatpush1.msra.mxu0 %v2539_v38  ;;  %2062 = vmatpush3.msra.mxu1 %v2653_v0 }
 0x1ab   :  { %625 = vmatprep.subr.mxu0 %v2542_v39  ;;  %2063 = vmatprep.subr.mxu1 %v3350_v42 }
 0x1ac   :  { %626 = vmatpush1.msra.mxu0 %v2545_v40  ;;  %2064 = vmatpush3.msra.mxu1 %v2657_v2 }
 0x1ad   :  { %627 = vmatprep.subr.mxu0 %v3351_v41  ;;  %2065 = vmatprep.subr.mxu1 %v3350_v42 }
 0x1ae   :  { %628 = vmatpush1.msra.mxu0 %v3352_v14  ;;  %661 = vmatprep.mubr.f32.mxu0 %v3350_v42 }
 0x1af   :  { %2066 = vmatpush3.msra.mxu1 %v3353_v19  ;;  %2067 = vmatprep.mubr.msk.f32.mxu1 %vm2434_vm2, %v3350_v42 }
 0x1b0   :  { %773 = vmatprep.subr.mxu0 %v3354_v26  ;;  %2070 = vmatprep.subr.mxu1 %v3350_v42 }
 0x24f   :  { %v486_v44 = vpop.f32.mrf.mxu0  ;;  %v557_v45 = vpop.f32.mrf.mxu1 }
 0x250   :  { %v487_v50 = vadd.f32 %v486_v44, %v3355_v46  ;;  %v558_v44 = vadd.f32 %v557_v45, %v2724_v3  ;;  %v3360_v45 = vld [vmem:[#allocation14_spill] sm:$0xff] }
 0x251   :  { %v488_v18 = vpop.f32.mrf.mxu0  ;;  %v2034_v48 = vpop.f32.mrf.mxu1 }
 0x252   :  { %v563_v1 = vrot.slane %v487_v50, 7  ;;  %v489_v21 = vadd.f32 %v488_v18, %v2717_v43  ;;  %v582_v48 = vrot.slane %v558_v44, 7  ;;  %v3363_v44 = vld [vmem:[#allocation15_spill] sm:$0xff] }
 0x254   :  { %v567_v24 = vadd.f32 %v563_v1, %v3356_v23  ;;  %v564_v19 = vrot.slane %v489_v21, 7 }
 0x256   :  { %v1799_v14 = vmul.f32 -1.442695, %v567_v24  ;;  %v568_v41 = vadd.f32 %v564_v19, %v2715_v47  ;;  %v3362_v24 = vld [vmem:[#allocation12_spill] sm:$0xff] }
 0x258   :  { %2263 = vpow2.f32 %v1799_v14  ;;  %v1800_v2 = vmul.f32 -1.442695, %v568_v41  ;;  %v590_v14 = vrot.slane %v2728_v16, 7  ;;  %v3359_v16 = vld [vmem:[#allocation10_spill] sm:$0xff] }
 0x25a   :  { %2265 = vpow2.f32 %v1800_v2 }
 0x265   :  { %v2264_v26 = vpop.eup %2263 }
 0x266   :  { %v575_v40 = vadd.f32 1.0, %v2264_v26 }
 0x267   :  { %v2266_v39 = vpop.eup %2265 }
 0x268   :  { %2267 = vrcp.f32 %v575_v40  ;;  %v576_v46 = vadd.f32 1.0, %v2266_v39  ;;  %v3357_v39 = vld [vmem:[#allocation13_spill] sm:$0xff] }
 0x26a   :  { %2269 = vrcp.f32 %v576_v46  ;;  %v3361_v46 = vld [vmem:[#allocation11_spill] sm:$0xff] }
 0x275   :  { %v2268_v50 = vpop.eup %2267 }
 0x276   :  { %v584_v0 = vmul.f32 %v2268_v50, %v582_v48  ;;  %v3364_v48 = vld [vmem:[#allocation8_spill] sm:$0xff] }
 0x277   :  { %v2270_v1 = vpop.eup %2269 }
 0x278   :  { %v585_v18 = vadd.f32 %v584_v0, %v2719_v49  ;;  %v587_v19 = vsub.f32 1.0, %v2270_v1  ;;  %v592_v21 = vmul.f32 %v2270_v1, %v590_v14  ;;  %v3358_v0 = vld [vmem:[#allocation9_spill] sm:$0xff] }
 0x279   :  { %v3365_v1 = vld [vmem:[#allocation17_spill] sm:$0xff] }
 0x27a   :  { %2271 = vtanh.f32 %v585_v18 }
 0x287   :  { %v2272_v41 = vpop.eup %2271 }
 0x288   :  { %v588_v2 = vmul.f32 %v2272_v41, %v587_v19 }
 0x28a   :  { %v2806_v26 = vadd.f32 %v592_v21, %v588_v2 }
 0x28c   :  { %v595_v40 = vrot.slane %v2806_v26, 1 }
 0x28e   :  { %662 = vmatmul.mubr.f32.vlgmr.msra.gmra.mxu0 %v595_v40  ;;  %2068 = vmatmul.mubr.f32.vlgmr.msra.gmra.mxu1 %v595_v40 }
 0x28f   :  { %774 = vmatpush1.msra.mxu0 %v2461_v4  ;;  %2071 = vmatpush3.msra.mxu1 %v2599_v51 }
 0x290   :  { %775 = vmatprep.subr.mxu0 %v2464_v5  ;;  %2072 = vmatprep.subr.mxu1 %v3350_v42 }
 0x291   :  { %776 = vmatpush1.msra.mxu0 %v2466_v6  ;;  %2073 = vmatpush3.msra.mxu1 %v2603_v52 }
 0x292   :  { %777 = vmatprep.subr.mxu0 %v2469_v7  ;;  %2074 = vmatprep.subr.mxu1 %v3350_v42 }
 0x293   :  { %778 = vmatpush1.msra.mxu0 %v2472_v8  ;;  %2075 = vmatpush3.msra.mxu1 %v2609_v53 }
 0x294   :  { %779 = vmatprep.subr.mxu0 %v2475_v9  ;;  %2076 = vmatprep.subr.mxu1 %v3350_v42 }
 0x295   :  { %780 = vmatpush1.msra.mxu0 %v2478_v10  ;;  %2077 = vmatpush3.msra.mxu1 %v2613_v54 }
 0x296   :  { %781 = vmatprep.subr.mxu0 %v2481_v11  ;;  %2078 = vmatprep.subr.mxu1 %v3350_v42 }
 0x297   :  { %782 = vmatpush1.msra.mxu0 %v2484_v12  ;;  %2079 = vmatpush3.msra.mxu1 %v2617_v55 }
 0x298   :  { %783 = vmatprep.subr.mxu0 %v2487_v13  ;;  %2080 = vmatprep.subr.mxu1 %v3350_v42 }
 0x299   :  { %784 = vmatpush1.msra.mxu0 %v2490_v15  ;;  %2081 = vmatpush3.msra.mxu1 %v2621_v56 }
 0x29a   :  { %785 = vmatprep.subr.mxu0 %v2493_v17  ;;  %2082 = vmatprep.subr.mxu1 %v3350_v42 }
 0x29b   :  { %786 = vmatpush1.msra.mxu0 %v2496_v20  ;;  %2083 = vmatpush3.msra.mxu1 %v2625_v57 }
 0x29c   :  { %787 = vmatprep.subr.mxu0 %v2499_v22  ;;  %2084 = vmatprep.subr.mxu1 %v3350_v42 }
 0x29d   :  { %788 = vmatpush1.msra.mxu0 %v2502_v25  ;;  %2085 = vmatpush3.msra.mxu1 %v2629_v58 }
 0x29e   :  { %789 = vmatprep.subr.mxu0 %v2505_v27  ;;  %2086 = vmatprep.subr.mxu1 %v3350_v42 }
 0x29f   :  { %790 = vmatpush1.msra.mxu0 %v2508_v28  ;;  %2087 = vmatpush3.msra.mxu1 %v2633_v59 }
 0x2a0   :  { %791 = vmatprep.subr.mxu0 %v2511_v29  ;;  %2088 = vmatprep.subr.mxu1 %v3350_v42 }
 0x2a1   :  { %792 = vmatpush1.msra.mxu0 %v2514_v30  ;;  %2089 = vmatpush3.msra.mxu1 %v2637_v60 }
 0x2a2   :  { %793 = vmatprep.subr.mxu0 %v2518_v31  ;;  %2090 = vmatprep.subr.mxu1 %v3350_v42 }
 0x2a3   :  { %794 = vmatpush1.msra.mxu0 %v2521_v32  ;;  %2091 = vmatpush3.msra.mxu1 %v2641_v61 }
 0x2a4   :  { %795 = vmatprep.subr.mxu0 %v2524_v33  ;;  %2092 = vmatprep.subr.mxu1 %v3350_v42 }
 0x2a5   :  { %796 = vmatpush1.msra.mxu0 %v2527_v34  ;;  %2093 = vmatpush3.msra.mxu1 %v2645_v62 }
 0x2a6   :  { %797 = vmatprep.subr.mxu0 %v2530_v35  ;;  %2094 = vmatprep.subr.mxu1 %v3350_v42 }
 0x2a7   :  { %798 = vmatpush1.msra.mxu0 %v2533_v36  ;;  %2095 = vmatpush3.msra.mxu1 %v2649_v63 }
 0x2a8   :  { %799 = vmatprep.subr.mxu0 %v2536_v37  ;;  %2096 = vmatprep.subr.mxu1 %v3350_v42 }
 0x2a9   :  { %800 = vmatpush1.msra.mxu0 %v2539_v38  ;;  %2097 = vmatpush3.msra.mxu1 %v3357_v39 }
 0x2aa   :  { %801 = vmatprep.subr.mxu0 %v3358_v0  ;;  %2098 = vmatprep.subr.mxu1 %v3350_v42 }
 0x2ab   :  { %802 = vmatpush1.msra.mxu0 %v3359_v16  ;;  %2099 = vmatpush3.msra.mxu1 %v3360_v45 }
 0x2ac   :  { %803 = vmatprep.subr.mxu0 %v3361_v46  ;;  %2100 = vmatprep.subr.mxu1 %v3350_v42 }
 0x2ad   :  { %804 = vmatpush1.msra.mxu0 %v3362_v24  ;;  %837 = vmatprep.mubr.f32.mxu0 %v3350_v42 }
 0x2ae   :  { %2101 = vmatpush3.msra.mxu1 %v3363_v44  ;;  %2102 = vmatprep.mubr.msk.f32.mxu1 %vm2434_vm2, %v3350_v42 }
 0x2af   :  { %949 = vmatprep.subr.mxu0 %v3364_v48  ;;  %2105 = vmatprep.subr.mxu1 %v3350_v42 }
 0x34e   :  { %v663_v50 = vpop.f32.mrf.mxu0  ;;  %v734_v18 = vpop.f32.mrf.mxu1 }
 0x34f   :  { %v664_v14 = vadd.f32 %v663_v50, %v3365_v1  ;;  %v735_v50 = vadd.f32 %v734_v18, %v2724_v3 }
 0x350   :  { %v665_v19 = vpop.f32.mrf.mxu0  ;;  %v2069_v41 = vpop.f32.mrf.mxu1 }
 0x351   :  { %v740_v2 = vrot.slane %v664_v14, 6  ;;  %v666_v21 = vadd.f32 %v665_v19, %v2717_v43  ;;  %v759_v41 = vrot.slane %v735_v50, 6 }
 0x353   :  { %v744_v40 = vadd.f32 %v740_v2, %v3356_v23  ;;  %v741_v44 = vrot.slane %v666_v21, 6 }
 0x355   :  { %v1801_v24 = vmul.f32 -1.442695, %v744_v40  ;;  %v745_v46 = vadd.f32 %v741_v44, %v2715_v47 }
 0x357   :  { %2273 = vpow2.f32 %v1801_v24  ;;  %v1802_v45 = vmul.f32 -1.442695, %v745_v46  ;;  %v766_v24 = vrot.slane %v2806_v26, 7 }
 0x359   :  { %2275 = vpow2.f32 %v1802_v45 }
 0x364   :  { %v2274_v48 = vpop.eup %2273 }
 0x365   :  { %v752_v16 = vadd.f32 1.0, %v2274_v48 }
 0x366   :  { %v2276_v0 = vpop.eup %2275 }
 0x367   :  { %2277 = vrcp.f32 %v752_v16  ;;  %v753_v1 = vadd.f32 1.0, %v2276_v0 }
 0x369   :  { %2279 = vrcp.f32 %v753_v1 }
 0x374   :  { %v2278_v14 = vpop.eup %2277 }
 0x375   :  { %v761_v39 = vmul.f32 %v2278_v14, %v759_v41 }
 0x376   :  { %v2280_v2 = vpop.eup %2279 }
 0x377   :  { %v762_v19 = vadd.f32 %v761_v39, %v2719_v49  ;;  %v764_v44 = vsub.f32 1.0, %v2280_v2  ;;  %v768_v21 = vmul.f32 %v2280_v2, %v766_v24  ;;  %v2965_v24 = vld [vmem:[#allocation2 + $0x1c8] sm:$0xff] }
 0x379   :  { %2281 = vtanh.f32 %v762_v19 }
 0x386   :  { %v2282_v46 = vpop.eup %2281 }
 0x387   :  { %v765_v45 = vmul.f32 %v2282_v46, %v764_v44  ;;  %v2969_v44 = vld [vmem:[#allocation2 + $0x1b8] sm:$0xff]  ;;  %v2973_v46 = vld [vmem:[#allocation2 + $0x1b0] sm:$0xff] }
 0x389   :  { %v2883_v40 = vadd.f32 %v768_v21, %v765_v45  ;;  %v2977_v45 = vld [vmem:[#allocation2 + $0x1a0] sm:$0xff]  ;;  %v2981_v21 = vld [vmem:[#allocation2 + $0x198] sm:$0xff] }
 0x38b   :  { %v771_v16 = vrot.slane %v2883_v40, 2  ;;  %v942_v1 = vrot.slane %v2883_v40, 7  ;;  %v2989_v40 = vld [vmem:[#allocation2 + $0x180] sm:$0xff] }
 0x38d   :  { %838 = vmatmul.mubr.f32.vlgmr.msra.gmra.mxu0 %v771_v16  ;;  %2103 = vmatmul.mubr.f32.vlgmr.msra.gmra.mxu1 %v771_v16  ;;  %v2997_v16 = vld [vmem:[#allocation2 + $0x168] sm:$0xff] }
 0x38e   :  { %950 = vmatpush1.msra.mxu0 %v2461_v4  ;;  %2106 = vmatpush3.msra.mxu1 %v2599_v51  ;;  %v3366_v4 = vld [vmem:[#allocation13_spill] sm:$0xff] }
 0x38f   :  { %951 = vmatprep.subr.mxu0 %v2464_v5  ;;  %2107 = vmatprep.subr.mxu1 %v3350_v42  ;;  %v3367_v5 = vld [vmem:[#allocation9_spill] sm:$0xff] }
 0x390   :  { %952 = vmatpush1.msra.mxu0 %v2466_v6  ;;  %2108 = vmatpush3.msra.mxu1 %v2603_v52  ;;  %v3368_v6 = vld [vmem:[#allocation10_spill] sm:$0xff] }
 0x391   :  { %953 = vmatprep.subr.mxu0 %v2469_v7  ;;  %2109 = vmatprep.subr.mxu1 %v3350_v42  ;;  %v3369_v7 = vld [vmem:[#allocation14_spill] sm:$0xff] }
 0x392   :  { %954 = vmatpush1.msra.mxu0 %v2472_v8  ;;  %2110 = vmatpush3.msra.mxu1 %v2609_v53  ;;  %v3370_v8 = vld [vmem:[#allocation11_spill] sm:$0xff] }
 0x393   :  { %955 = vmatprep.subr.mxu0 %v2475_v9  ;;  %2111 = vmatprep.subr.mxu1 %v3350_v42  ;;  %v3371_v9 = vld [vmem:[#allocation12_spill] sm:$0xff] }
 0x394   :  { %956 = vmatpush1.msra.mxu0 %v2478_v10  ;;  %2112 = vmatpush3.msra.mxu1 %v2613_v54  ;;  %v3372_v10 = vld [vmem:[#allocation15_spill] sm:$0xff] }
 0x395   :  { %957 = vmatprep.subr.mxu0 %v2481_v11  ;;  %2113 = vmatprep.subr.mxu1 %v3350_v42  ;;  %v2951_v11 = vld [vmem:[#allocation2 + $0x1d0] sm:$0xff] }
 0x396   :  { %958 = vmatpush1.msra.mxu0 %v2484_v12  ;;  %2114 = vmatpush3.msra.mxu1 %v2617_v55 }
 0x397   :  { %959 = vmatprep.subr.mxu0 %v2487_v13  ;;  %2115 = vmatprep.subr.mxu1 %v3350_v42 }
 0x398   :  { %960 = vmatpush1.msra.mxu0 %v2490_v15  ;;  %2116 = vmatpush3.msra.mxu1 %v2621_v56  ;;  %v3373_v15 = vld [vmem:[#allocation17_spill] sm:$0xff] }
 0x399   :  { %961 = vmatprep.subr.mxu0 %v2493_v17  ;;  %2117 = vmatprep.subr.mxu1 %v3350_v42 }
 0x39a   :  { %962 = vmatpush1.msra.mxu0 %v2496_v20  ;;  %2118 = vmatpush3.msra.mxu1 %v2625_v57 }
 0x39b   :  { %963 = vmatprep.subr.mxu0 %v2499_v22  ;;  %2119 = vmatprep.subr.mxu1 %v3350_v42 }
 0x39c   :  { %964 = vmatpush1.msra.mxu0 %v2502_v25  ;;  %2120 = vmatpush3.msra.mxu1 %v2629_v58 }
 0x39d   :  { %965 = vmatprep.subr.mxu0 %v2505_v27  ;;  %2121 = vmatprep.subr.mxu1 %v3350_v42 }
 0x39e   :  { %966 = vmatpush1.msra.mxu0 %v2508_v28  ;;  %2122 = vmatpush3.msra.mxu1 %v2633_v59 }
 0x39f   :  { %967 = vmatprep.subr.mxu0 %v2511_v29  ;;  %2123 = vmatprep.subr.mxu1 %v3350_v42 }
 0x3a0   :  { %968 = vmatpush1.msra.mxu0 %v2514_v30  ;;  %2124 = vmatpush3.msra.mxu1 %v2637_v60 }
 0x3a1   :  { %969 = vmatprep.subr.mxu0 %v2518_v31  ;;  %2125 = vmatprep.subr.mxu1 %v3350_v42 }
 0x3a2   :  { %970 = vmatpush1.msra.mxu0 %v2521_v32  ;;  %2126 = vmatpush3.msra.mxu1 %v2641_v61 }
 0x3a3   :  { %971 = vmatprep.subr.mxu0 %v2524_v33  ;;  %2127 = vmatprep.subr.mxu1 %v3350_v42 }
 0x3a4   :  { %972 = vmatpush1.msra.mxu0 %v2527_v34  ;;  %2128 = vmatpush3.msra.mxu1 %v2645_v62 }
 0x3a5   :  { %973 = vmatprep.subr.mxu0 %v2530_v35  ;;  %2129 = vmatprep.subr.mxu1 %v3350_v42 }
 0x3a6   :  { %974 = vmatpush1.msra.mxu0 %v2533_v36  ;;  %2130 = vmatpush3.msra.mxu1 %v2649_v63 }
 0x3a7   :  { %975 = vmatprep.subr.mxu0 %v2536_v37  ;;  %2131 = vmatprep.subr.mxu1 %v3350_v42 }
 0x3a8   :  { %976 = vmatpush1.msra.mxu0 %v2539_v38  ;;  %2132 = vmatpush3.msra.mxu1 %v3366_v4 }
 0x3a9   :  { %977 = vmatprep.subr.mxu0 %v3367_v5  ;;  %2133 = vmatprep.subr.mxu1 %v3350_v42  ;;  %v3005_v5 = vld [vmem:[#allocation2 + $0x150] sm:$0xff] }
 0x3aa   :  { %978 = vmatpush1.msra.mxu0 %v3368_v6  ;;  %2134 = vmatpush3.msra.mxu1 %v3369_v7  ;;  %v3013_v6 = vld [vmem:[#allocation2 + $0x138] sm:$0xff] }
 0x3ab   :  { %979 = vmatprep.subr.mxu0 %v3370_v8  ;;  %2135 = vmatprep.subr.mxu1 %v3350_v42  ;;  %v3021_v8 = vld [vmem:[#allocation2 + $0x120] sm:$0xff] }
 0x3ac   :  { %980 = vmatpush1.msra.mxu0 %v3371_v9  ;;  %1013 = vmatprep.mubr.f32.mxu0 %v3350_v42  ;;  %v3029_v9 = vld [vmem:[#allocation2 + $0x108] sm:$0xff] }
 0x3ad   :  { %2136 = vmatpush3.msra.mxu1 %v3372_v10  ;;  %2137 = vmatprep.mubr.msk.f32.mxu1 %vm2434_vm2, %v3350_v42 }
 0x3ae   :  { %1125 = vmatprep.subr.mxu0 %v2951_v11  ;;  %2140 = vmatprep.subr.mxu1 %v3350_v42 }
 0x44d   :  { %v839_v12 = vpop.f32.mrf.mxu0  ;;  %v910_v13 = vpop.f32.mrf.mxu1 }
 0x44e   :  { %v840_v17 = vadd.f32 %v839_v12, %v3373_v15  ;;  %v911_v36 = vadd.f32 %v910_v13, %v2724_v3  ;;  %v3037_v12 = vld [vmem:[#allocation2 + $0xf0] sm:$0xff]  ;;  %v3045_v13 = vld [vmem:[#allocation2 + $0xd8] sm:$0xff] }
 0x44f   :  { %v841_v20 = vpop.f32.mrf.mxu0  ;;  %v2104_v22 = vpop.f32.mrf.mxu1 }
 0x450   :  { %v916_v25 = vrot.slane %v840_v17, 5  ;;  %v842_v27 = vadd.f32 %v841_v20, %v2717_v43  ;;  %v935_v38 = vrot.slane %v911_v36, 5  ;;  %v3053_v17 = vld [vmem:[#allocation2 + $0xc0] sm:$0xff]  ;;  %v3061_v20 = vld [vmem:[#allocation2 + $0xa8] sm:$0xff]  ;;  %v3069_v22 = vld [vmem:[#allocation2 + $0x90] sm:$0xff] }
 0x452   :  { %v920_v28 = vadd.f32 %v916_v25, %v3356_v23  ;;  %v917_v30 = vrot.slane %v842_v27, 5  ;;  %v3077_v25 = vld [vmem:[#allocation2 + $0x78] sm:$0xff]  ;;  %v3085_v27 = vld [vmem:[#allocation2 + $0x60] sm:$0xff] }
 0x453   :  { %3375 = vst [vmem:[#allocation8_spill] sm:$0xff] %v3077_v25  ;;  %3377 = vst [vmem:[#allocation9_spill] sm:$0xff] %v3085_v27 }
 0x454   :  { %v1803_v29 = vmul.f32 -1.442695, %v920_v28  ;;  %v921_v31 = vadd.f32 %v917_v30, %v2715_v47 }
 0x456   :  { %2283 = vpow2.f32 %v1803_v29  ;;  %v1804_v32 = vmul.f32 -1.442695, %v921_v31 }
 0x458   :  { %2285 = vpow2.f32 %v1804_v32 }
 0x463   :  { %v2284_v33 = vpop.eup %2283 }
 0x464   :  { %v928_v34 = vadd.f32 1.0, %v2284_v33 }
 0x465   :  { %v2286_v35 = vpop.eup %2285 }
 0x466   :  { %2287 = vrcp.f32 %v928_v34  ;;  %v929_v37 = vadd.f32 1.0, %v2286_v35 }
 0x468   :  { %2289 = vrcp.f32 %v929_v37 }
 0x473   :  { %v2288_v26 = vpop.eup %2287 }
 0x474   :  { %v937_v39 = vmul.f32 %v2288_v26, %v935_v38 }
 0x475   :  { %v2290_v18 = vpop.eup %2289 }
 0x476   :  { %v938_v0 = vadd.f32 %v937_v39, %v2719_v49  ;;  %v940_v48 = vsub.f32 1.0, %v2290_v18  ;;  %v944_v14 = vmul.f32 %v2290_v18, %v942_v1 }
 0x478   :  { %2291 = vtanh.f32 %v938_v0 }
 0x485   :  { %v2292_v50 = vpop.eup %2291 }
 0x486   :  { %v941_v41 = vmul.f32 %v2292_v50, %v940_v48 }
 0x488   :  { %v2962_v19 = vadd.f32 %v944_v14, %v941_v41 }
 0x48a   :  { %v947_v2 = vrot.slane %v2962_v19, 3  ;;  %v1118_v14 = vrot.slane %v2962_v19, 7  ;;  %v3111_v19 = vld [vmem:[#allocation2 + $0x1c0] sm:$0xff] }
 0x48c   :  { %1014 = vmatmul.mubr.f32.vlgmr.msra.gmra.mxu0 %v947_v2  ;;  %2138 = vmatmul.mubr.f32.vlgmr.msra.gmra.mxu1 %v947_v2 }
 0x48d   :  { %1126 = vmatpush1.msra.mxu0 %v2965_v24  ;;  %2141 = vmatpush3.msra.mxu1 %v2599_v51  ;;  %v2985_v51 = vld [vmem:[#allocation2 + $0x188] sm:$0xff] }
 0x48e   :  { %1127 = vmatprep.subr.mxu0 %v2969_v44  ;;  %2142 = vmatprep.subr.mxu1 %v3350_v42 }
 0x48f   :  { %1128 = vmatpush1.msra.mxu0 %v2973_v46  ;;  %2143 = vmatpush3.msra.mxu1 %v2603_v52  ;;  %v2993_v52 = vld [vmem:[#allocation2 + $0x170] sm:$0xff] }
 0x490   :  { %1129 = vmatprep.subr.mxu0 %v2977_v45  ;;  %2144 = vmatprep.subr.mxu1 %v3350_v42 }
 0x491   :  { %1130 = vmatpush1.msra.mxu0 %v2981_v21  ;;  %2145 = vmatpush3.msra.mxu1 %v2609_v53  ;;  %v3001_v53 = vld [vmem:[#allocation2 + $0x158] sm:$0xff] }
 0x492   :  { %1131 = vmatprep.subr.mxu0 %v2985_v51  ;;  %2146 = vmatprep.subr.mxu1 %v3350_v42 }
 0x493   :  { %1132 = vmatpush1.msra.mxu0 %v2989_v40  ;;  %2147 = vmatpush3.msra.mxu1 %v2613_v54  ;;  %v3009_v54 = vld [vmem:[#allocation2 + $0x140] sm:$0xff] }
 0x494   :  { %1133 = vmatprep.subr.mxu0 %v2993_v52  ;;  %2148 = vmatprep.subr.mxu1 %v3350_v42 }
 0x495   :  { %1134 = vmatpush1.msra.mxu0 %v2997_v16  ;;  %2149 = vmatpush3.msra.mxu1 %v2617_v55  ;;  %v3017_v55 = vld [vmem:[#allocation2 + $0x128] sm:$0xff] }
 0x496   :  { %1135 = vmatprep.subr.mxu0 %v3001_v53  ;;  %2150 = vmatprep.subr.mxu1 %v3350_v42 }
 0x497   :  { %1136 = vmatpush1.msra.mxu0 %v3005_v5  ;;  %2151 = vmatpush3.msra.mxu1 %v2621_v56  ;;  %v3025_v56 = vld [vmem:[#allocation2 + $0x110] sm:$0xff] }
 0x498   :  { %1137 = vmatprep.subr.mxu0 %v3009_v54  ;;  %2152 = vmatprep.subr.mxu1 %v3350_v42 }
 0x499   :  { %1138 = vmatpush1.msra.mxu0 %v3013_v6  ;;  %2153 = vmatpush3.msra.mxu1 %v2625_v57  ;;  %v3033_v57 = vld [vmem:[#allocation2 + $0xf8] sm:$0xff] }
 0x49a   :  { %1139 = vmatprep.subr.mxu0 %v3017_v55  ;;  %2154 = vmatprep.subr.mxu1 %v3350_v42 }
 0x49b   :  { %1140 = vmatpush1.msra.mxu0 %v3021_v8  ;;  %2155 = vmatpush3.msra.mxu1 %v2629_v58  ;;  %v3041_v58 = vld [vmem:[#allocation2 + $0xe0] sm:$0xff] }
 0x49c   :  { %1141 = vmatprep.subr.mxu0 %v3025_v56  ;;  %2156 = vmatprep.subr.mxu1 %v3350_v42 }
 0x49d   :  { %1142 = vmatpush1.msra.mxu0 %v3029_v9  ;;  %2157 = vmatpush3.msra.mxu1 %v2633_v59  ;;  %v3049_v59 = vld [vmem:[#allocation2 + $0xc8] sm:$0xff] }
 0x49e   :  { %1143 = vmatprep.subr.mxu0 %v3033_v57  ;;  %2158 = vmatprep.subr.mxu1 %v3350_v42 }
 0x49f   :  { %1144 = vmatpush1.msra.mxu0 %v3037_v12  ;;  %2159 = vmatpush3.msra.mxu1 %v2637_v60  ;;  %v3057_v60 = vld [vmem:[#allocation2 + $0xb0] sm:$0xff] }
 0x4a0   :  { %1145 = vmatprep.subr.mxu0 %v3041_v58  ;;  %2160 = vmatprep.subr.mxu1 %v3350_v42 }
 0x4a1   :  { %1146 = vmatpush1.msra.mxu0 %v3045_v13  ;;  %2161 = vmatpush3.msra.mxu1 %v2641_v61  ;;  %v3065_v61 = vld [vmem:[#allocation2 + $0x98] sm:$0xff] }
 0x4a2   :  { %1147 = vmatprep.subr.mxu0 %v3049_v59  ;;  %2162 = vmatprep.subr.mxu1 %v3350_v42 }
 0x4a3   :  { %1148 = vmatpush1.msra.mxu0 %v3053_v17  ;;  %2163 = vmatpush3.msra.mxu1 %v2645_v62  ;;  %v3073_v62 = vld [vmem:[#allocation2 + $0x80] sm:$0xff] }
 0x4a4   :  { %1149 = vmatprep.subr.mxu0 %v3057_v60  ;;  %2164 = vmatprep.subr.mxu1 %v3350_v42  ;;  %3374 = vst [vmem:[#allocation18_spill] sm:$0xff] %v3073_v62 }
 0x4a5   :  { %1150 = vmatpush1.msra.mxu0 %v3061_v20  ;;  %2165 = vmatpush3.msra.mxu1 %v2649_v63  ;;  %v3081_v63 = vld [vmem:[#allocation2 + $0x68] sm:$0xff] }
 0x4a6   :  { %1151 = vmatprep.subr.mxu0 %v3065_v61  ;;  %2166 = vmatprep.subr.mxu1 %v3350_v42  ;;  %3376 = vst [vmem:[#allocation13_spill] sm:$0xff] %v3081_v63 }
 0x4a7   :  { %1152 = vmatpush1.msra.mxu0 %v3069_v22  ;;  %2167 = vmatpush3.msra.mxu1 %v3366_v4 }
 0x4a8   :  { %1153 = vmatprep.subr.mxu0 %v3073_v62  ;;  %2168 = vmatprep.subr.mxu1 %v3350_v42 }
 0x4a9   :  { %1154 = vmatpush1.msra.mxu0 %v3077_v25  ;;  %2169 = vmatpush3.msra.mxu1 %v3369_v7 }
 0x4aa   :  { %1155 = vmatprep.subr.mxu0 %v3081_v63  ;;  %2170 = vmatprep.subr.mxu1 %v3350_v42 }
 0x4ab   :  { %1156 = vmatpush1.msra.mxu0 %v3085_v27  ;;  %1189 = vmatprep.mubr.f32.mxu0 %v3350_v42 }
 0x4ac   :  { %2171 = vmatpush3.msra.mxu1 %v3372_v10  ;;  %2172 = vmatprep.mubr.msk.f32.mxu1 %vm2434_vm2, %v3350_v42 }
 0x4ad   :  { %1301 = vmatprep.subr.mxu0 %v2951_v11  ;;  %2175 = vmatprep.subr.mxu1 %v3350_v42 }
 0x54c   :  { %v1015_v4 = vpop.f32.mrf.mxu0  ;;  %v1086_v7 = vpop.f32.mrf.mxu1 }
 0x54d   :  { %v1016_v28 = vadd.f32 %v1015_v4, %v3373_v15  ;;  %v1087_v39 = vadd.f32 %v1086_v7, %v2724_v3  ;;  %v3105_v7 = vld [vmem:[#allocation2 + $0x1d8] sm:$0xff] }
 0x54e   :  { %v1017_v29 = vpop.f32.mrf.mxu0  ;;  %v2139_v30 = vpop.f32.mrf.mxu1 }
 0x54f   :  { %v1092_v31 = vrot.slane %v1016_v28, 4  ;;  %v1018_v32 = vadd.f32 %v1017_v29, %v2717_v43  ;;  %v1111_v18 = vrot.slane %v1087_v39, 4  ;;  %v3171_v39 = vld [vmem:[#allocation2 + $0xd0] sm:$0xff] }
 0x551   :  { %v1096_v33 = vadd.f32 %v1092_v31, %v3356_v23  ;;  %v1093_v10 = vrot.slane %v1018_v32, 4  ;;  %v3117_v32 = vld [vmem:[#allocation2 + $0x1a8] sm:$0xff] }
 0x553   :  { %v1805_v34 = vmul.f32 -1.442695, %v1096_v33  ;;  %v1097_v35 = vadd.f32 %v1093_v10, %v2715_v47  ;;  %v3123_v33 = vld [vmem:[#allocation2 + $0x190] sm:$0xff]  ;;  %v3135_v10 = vld [vmem:[#allocation2 + $0x160] sm:$0xff] }
 0x555   :  { %2293 = vpow2.f32 %v1805_v34  ;;  %v1806_v36 = vmul.f32 -1.442695, %v1097_v35  ;;  %v3129_v34 = vld [vmem:[#allocation2 + $0x178] sm:$0xff]  ;;  %v3141_v35 = vld [vmem:[#allocation2 + $0x148] sm:$0xff] }
 0x557   :  { %2295 = vpow2.f32 %v1806_v36  ;;  %v3147_v36 = vld [vmem:[#allocation2 + $0x130] sm:$0xff] }
 0x562   :  { %v2294_v37 = vpop.eup %2293 }
 0x563   :  { %v1104_v38 = vadd.f32 1.0, %v2294_v37  ;;  %v3153_v37 = vld [vmem:[#allocation2 + $0x118] sm:$0xff] }
 0x564   :  { %v2296_v26 = vpop.eup %2295 }
 0x565   :  { %2297 = vrcp.f32 %v1104_v38  ;;  %v1105_v0 = vadd.f32 1.0, %v2296_v26  ;;  %v3159_v38 = vld [vmem:[#allocation2 + $0x100] sm:$0xff]  ;;  %v3165_v26 = vld [vmem:[#allocation2 + $0xe8] sm:$0xff] }
 0x567   :  { %2299 = vrcp.f32 %v1105_v0  ;;  %v3177_v0 = vld [vmem:[#allocation2 + $0xb8] sm:$0xff] }
 0x572   :  { %v2298_v1 = vpop.eup %2297 }
 0x573   :  { %v1113_v48 = vmul.f32 %v2298_v1, %v1111_v18  ;;  %v3183_v18 = vld [vmem:[#allocation2 + $0xa0] sm:$0xff]  ;;  %v3189_v1 = vld [vmem:[#allocation2 + $0x88] sm:$0xff] }
 0x574   :  { %v2300_v41 = vpop.eup %2299  ;;  %3378 = vst [vmem:[#allocation10_spill] sm:$0xff] %v3183_v18  ;;  %3379 = vst [vmem:[#allocation14_spill] sm:$0xff] %v3189_v1 }
 0x575   :  { %v1114_v50 = vadd.f32 %v1113_v48, %v2719_v49  ;;  %v1116_v2 = vsub.f32 1.0, %v2300_v41  ;;  %v1120_v29 = vmul.f32 %v2300_v41, %v1118_v14  ;;  %v3196_v48 = vld [vmem:[#allocation2 + $0x70] sm:$0xff] }
 0x576   :  { %3380 = vst [vmem:[#allocation11_spill] sm:$0xff] %v3196_v48 }
 0x577   :  { %2301 = vtanh.f32 %v1114_v50 }
 0x584   :  { %v2302_v4 = vpop.eup %2301 }
 0x585   :  { %v1117_v28 = vmul.f32 %v2302_v4, %v1116_v2 }
 0x587   :  { %v3101_v30 = vadd.f32 %v1120_v29, %v1117_v28 }
 0x589   :  { %v1123_v31 = vrot.slane %v3101_v30, 4 }
 0x58b   :  { %1190 = vmatmul.mubr.f32.vlgmr.msra.gmra.mxu0 %v1123_v31  ;;  %2173 = vmatmul.mubr.f32.vlgmr.msra.gmra.mxu1 %v1123_v31 }
 0x58c   :  { %1302 = vmatpush1.msra.mxu0 %v2965_v24  ;;  %2176 = vmatpush3.msra.mxu1 %v3105_v7 }
 0x58d   :  { %1303 = vmatprep.subr.mxu0 %v2969_v44  ;;  %2177 = vmatprep.subr.mxu1 %v3350_v42 }
 0x58e   :  { %1304 = vmatpush1.msra.mxu0 %v2973_v46  ;;  %2178 = vmatpush3.msra.mxu1 %v3111_v19 }
 0x58f   :  { %1305 = vmatprep.subr.mxu0 %v2977_v45  ;;  %2179 = vmatprep.subr.mxu1 %v3350_v42 }
 0x590   :  { %1306 = vmatpush1.msra.mxu0 %v2981_v21  ;;  %2180 = vmatpush3.msra.mxu1 %v3117_v32 }
 0x591   :  { %1307 = vmatprep.subr.mxu0 %v2985_v51  ;;  %2181 = vmatprep.subr.mxu1 %v3350_v42 }
 0x592   :  { %1308 = vmatpush1.msra.mxu0 %v2989_v40  ;;  %2182 = vmatpush3.msra.mxu1 %v3123_v33 }
 0x593   :  { %1309 = vmatprep.subr.mxu0 %v2993_v52  ;;  %2183 = vmatprep.subr.mxu1 %v3350_v42 }
 0x594   :  { %1310 = vmatpush1.msra.mxu0 %v2997_v16  ;;  %2184 = vmatpush3.msra.mxu1 %v3129_v34 }
 0x595   :  { %1311 = vmatprep.subr.mxu0 %v3001_v53  ;;  %2185 = vmatprep.subr.mxu1 %v3350_v42 }
 0x596   :  { %1312 = vmatpush1.msra.mxu0 %v3005_v5  ;;  %2186 = vmatpush3.msra.mxu1 %v3135_v10 }
 0x597   :  { %1313 = vmatprep.subr.mxu0 %v3009_v54  ;;  %2187 = vmatprep.subr.mxu1 %v3350_v42 }
 0x598   :  { %1314 = vmatpush1.msra.mxu0 %v3013_v6  ;;  %2188 = vmatpush3.msra.mxu1 %v3141_v35 }
 0x599   :  { %1315 = vmatprep.subr.mxu0 %v3017_v55  ;;  %2189 = vmatprep.subr.mxu1 %v3350_v42 }
 0x59a   :  { %1316 = vmatpush1.msra.mxu0 %v3021_v8  ;;  %2190 = vmatpush3.msra.mxu1 %v3147_v36 }
 0x59b   :  { %1317 = vmatprep.subr.mxu0 %v3025_v56  ;;  %2191 = vmatprep.subr.mxu1 %v3350_v42 }
 0x59c   :  { %1318 = vmatpush1.msra.mxu0 %v3029_v9  ;;  %2192 = vmatpush3.msra.mxu1 %v3153_v37 }
 0x59d   :  { %1319 = vmatprep.subr.mxu0 %v3033_v57  ;;  %2193 = vmatprep.subr.mxu1 %v3350_v42 }
 0x59e   :  { %1320 = vmatpush1.msra.mxu0 %v3037_v12  ;;  %2194 = vmatpush3.msra.mxu1 %v3159_v38 }
 0x59f   :  { %1321 = vmatprep.subr.mxu0 %v3041_v58  ;;  %2195 = vmatprep.subr.mxu1 %v3350_v42 }
 0x5a0   :  { %1322 = vmatpush1.msra.mxu0 %v3045_v13  ;;  %2196 = vmatpush3.msra.mxu1 %v3165_v26 }
 0x5a1   :  { %1323 = vmatprep.subr.mxu0 %v3049_v59  ;;  %2197 = vmatprep.subr.mxu1 %v3350_v42 }
 0x5a2   :  { %1324 = vmatpush1.msra.mxu0 %v3053_v17  ;;  %2198 = vmatpush3.msra.mxu1 %v3171_v39 }
 0x5a3   :  { %1325 = vmatprep.subr.mxu0 %v3057_v60  ;;  %2199 = vmatprep.subr.mxu1 %v3350_v42 }
 0x5a4   :  { %1326 = vmatpush1.msra.mxu0 %v3061_v20  ;;  %2200 = vmatpush3.msra.mxu1 %v3177_v0 }
 0x5a5   :  { %1327 = vmatprep.subr.mxu0 %v3065_v61  ;;  %2201 = vmatprep.subr.mxu1 %v3350_v42 }
 0x5a6   :  { %1328 = vmatpush1.msra.mxu0 %v3069_v22  ;;  %2202 = vmatpush3.msra.mxu1 %v3183_v18 }
 0x5a7   :  { %1329 = vmatprep.subr.mxu0 %v3073_v62  ;;  %2203 = vmatprep.subr.mxu1 %v3350_v42 }
 0x5a8   :  { %1330 = vmatpush1.msra.mxu0 %v3077_v25  ;;  %2204 = vmatpush3.msra.mxu1 %v3189_v1 }
 0x5a9   :  { %1331 = vmatprep.subr.mxu0 %v3081_v63  ;;  %2205 = vmatprep.subr.mxu1 %v3350_v42 }
 0x5aa   :  { %1332 = vmatpush1.msra.mxu0 %v3085_v27  ;;  %1365 = vmatprep.mubr.f32.mxu0 %v3350_v42 }
 0x5ab   :  { %2206 = vmatpush3.msra.mxu1 %v3196_v48  ;;  %2207 = vmatprep.mubr.msk.f32.mxu1 %vm2434_vm2, %v3350_v42 }
 0x5ac   :  { %1477 = vmatprep.subr.mxu0 %v2951_v11  ;;  %2210 = vmatprep.subr.mxu1 %v3350_v42 }
 0x64b   :  { %v1191_v50 = vpop.f32.mrf.mxu0  ;;  %v1262_v41 = vpop.f32.mrf.mxu1 }
 0x64c   :  { %v1192_v14 = vadd.f32 %v1191_v50, %v3373_v15  ;;  %v1263_v50 = vadd.f32 %v1262_v41, %v2724_v3  ;;  %v1674_v41 = vld [vmem:[#allocation2 + $0x318] sm:$0xff] }
 0x64d   :  { %v1193_v2 = vpop.f32.mrf.mxu0  ;;  %v2174_v4 = vpop.f32.mrf.mxu1 }
 0x64e   :  { %v1268_v28 = vrot.slane %v1192_v14, 3  ;;  %v1194_v29 = vadd.f32 %v1193_v2, %v2717_v43  ;;  %v1287_v4 = vrot.slane %v1263_v50, 3  ;;  %v1672_v50 = vld [vmem:[#allocation2 + $0x300] sm:$0xff] }
 0x650   :  { %v1272_v31 = vadd.f32 %v1268_v28, %v3356_v23  ;;  %v1269_v48 = vrot.slane %v1194_v29, 3 }
 0x652   :  { %v1807_v27 = vmul.f32 -1.442695, %v1272_v31  ;;  %v1273_v63 = vadd.f32 %v1269_v48, %v2715_v47 }
 0x654   :  { %2303 = vpow2.f32 %v1807_v27  ;;  %v1808_v1 = vmul.f32 -1.442695, %v1273_v63  ;;  %v1294_v27 = vrot.slane %v3101_v30, 7 }
 0x656   :  { %2305 = vpow2.f32 %v1808_v1 }
 0x661   :  { %v2304_v11 = vpop.eup %2303 }
 0x662   :  { %v1280_v25 = vadd.f32 1.0, %v2304_v11  ;;  %v1673_v11 = vld [vmem:[#allocation2 + $0x308] sm:$0xff] }
 0x663   :  { %v2306_v62 = vpop.eup %2305 }
 0x664   :  { %2307 = vrcp.f32 %v1280_v25  ;;  %v1281_v15 = vadd.f32 1.0, %v2306_v62 }
 0x666   :  { %2309 = vrcp.f32 %v1281_v15  ;;  %v3381_v15 = vld [vmem:[#allocation10_spill] sm:$0xff] }
 0x671   :  { %v2308_v14 = vpop.eup %2307 }
 0x672   :  { %v1289_v18 = vmul.f32 %v2308_v14, %v1287_v4  ;;  %v1670_v4 = vld [vmem:[#allocation2 + $0x2e8] sm:$0xff]  ;;  %v1669_v14 = vld [vmem:[#allocation2 + $0x2d8] sm:$0xff] }
 0x673   :  { %v2310_v28 = vpop.eup %2309 }
 0x674   :  { %v1290_v2 = vadd.f32 %v1289_v18, %v2719_v49  ;;  %v1292_v48 = vsub.f32 1.0, %v2310_v28  ;;  %v1296_v29 = vmul.f32 %v2310_v28, %v1294_v27  ;;  %v1675_v18 = vld [vmem:[#allocation2 + $0x320] sm:$0xff]  ;;  %v1666_v27 = vld [vmem:[#allocation2 + $0x2b8] sm:$0xff] }
 0x675   :  { %v1667_v28 = vld [vmem:[#allocation2 + $0x2c0] sm:$0xff] }
 0x676   :  { %2311 = vtanh.f32 %v1290_v2  ;;  %v1668_v2 = vld [vmem:[#allocation2 + $0x2d0] sm:$0xff] }
 0x683   :  { %v2312_v63 = vpop.eup %2311 }
 0x684   :  { %v1293_v1 = vmul.f32 %v2312_v63, %v1292_v48  ;;  %v1665_v48 = vld [vmem:[#allocation2 + $0x2a8] sm:$0xff]  ;;  %v1664_v63 = vld [vmem:[#allocation2 + $0x2a0] sm:$0xff] }
 0x686   :  { %v3210_v31 = vadd.f32 %v1296_v29, %v1293_v1  ;;  %v1663_v1 = vld [vmem:[#allocation2 + $0x290] sm:$0xff]  ;;  %v1662_v29 = vld [vmem:[#allocation2 + $0x288] sm:$0xff] }
 0x688   :  { %v1299_v25 = vrot.slane %v3210_v31, 5 }
 0x68a   :  { %1366 = vmatmul.mubr.f32.vlgmr.msra.gmra.mxu0 %v1299_v25  ;;  %2208 = vmatmul.mubr.f32.vlgmr.msra.gmra.mxu1 %v1299_v25  ;;  %v1660_v25 = vld [vmem:[#allocation2 + $0x270] sm:$0xff] }
 0x68b   :  { %1478 = vmatpush1.msra.mxu0 %v2965_v24  ;;  %2211 = vmatpush3.msra.mxu1 %v3105_v7  ;;  %v3382_v24 = vld [vmem:[#allocation18_spill] sm:$0xff]  ;;  %v1470_v7 = vrot.slane %v3210_v31, 7  ;;  %v1661_v31 = vld [vmem:[#allocation2 + $0x278] sm:$0xff] }
 0x68c   :  { %1479 = vmatprep.subr.mxu0 %v2969_v44  ;;  %2212 = vmatprep.subr.mxu1 %v3350_v42  ;;  %v3383_v44 = vld [vmem:[#allocation8_spill] sm:$0xff] }
 0x68d   :  { %1480 = vmatpush1.msra.mxu0 %v2973_v46  ;;  %2213 = vmatpush3.msra.mxu1 %v3111_v19  ;;  %v3384_v46 = vld [vmem:[#allocation14_spill] sm:$0xff] }
 0x68e   :  { %1481 = vmatprep.subr.mxu0 %v2977_v45  ;;  %2214 = vmatprep.subr.mxu1 %v3350_v42  ;;  %v3385_v45 = vld [vmem:[#allocation13_spill] sm:$0xff] }
 0x68f   :  { %1482 = vmatpush1.msra.mxu0 %v2981_v21  ;;  %2215 = vmatpush3.msra.mxu1 %v3117_v32  ;;  %v3386_v21 = vld [vmem:[#allocation9_spill] sm:$0xff] }
 0x690   :  { %1483 = vmatprep.subr.mxu0 %v2985_v51  ;;  %2216 = vmatprep.subr.mxu1 %v3350_v42  ;;  %v3387_v51 = vld [vmem:[#allocation11_spill] sm:$0xff] }
 0x691   :  { %1484 = vmatpush1.msra.mxu0 %v2989_v40  ;;  %2217 = vmatpush3.msra.mxu1 %v3123_v33 }
 0x692   :  { %1485 = vmatprep.subr.mxu0 %v2993_v52  ;;  %2218 = vmatprep.subr.mxu1 %v3350_v42 }
 0x693   :  { %1486 = vmatpush1.msra.mxu0 %v2997_v16  ;;  %2219 = vmatpush3.msra.mxu1 %v3129_v34  ;;  %v3388_v16 = vld [vmem:[#allocation17_spill] sm:$0xff] }
 0x694   :  { %1487 = vmatprep.subr.mxu0 %v3001_v53  ;;  %2220 = vmatprep.subr.mxu1 %v3350_v42 }
 0x695   :  { %1488 = vmatpush1.msra.mxu0 %v3005_v5  ;;  %2221 = vmatpush3.msra.mxu1 %v3135_v10 }
 0x696   :  { %1489 = vmatprep.subr.mxu0 %v3009_v54  ;;  %2222 = vmatprep.subr.mxu1 %v3350_v42 }
 0x697   :  { %1490 = vmatpush1.msra.mxu0 %v3013_v6  ;;  %2223 = vmatpush3.msra.mxu1 %v3141_v35 }
 0x698   :  { %1491 = vmatprep.subr.mxu0 %v3017_v55  ;;  %2224 = vmatprep.subr.mxu1 %v3350_v42 }
 0x699   :  { %1492 = vmatpush1.msra.mxu0 %v3021_v8  ;;  %2225 = vmatpush3.msra.mxu1 %v3147_v36  ;;  %v1681_v36 = vld [vmem:[#allocation2 + $0x368] sm:$0xff] }
 0x69a   :  { %1493 = vmatprep.subr.mxu0 %v3025_v56  ;;  %2226 = vmatprep.subr.mxu1 %v3350_v42 }
 0x69b   :  { %1494 = vmatpush1.msra.mxu0 %v3029_v9  ;;  %2227 = vmatpush3.msra.mxu1 %v3153_v37  ;;  %v1680_v37 = vld [vmem:[#allocation2 + $0x360] sm:$0xff] }
 0x69c   :  { %1495 = vmatprep.subr.mxu0 %v3033_v57  ;;  %2228 = vmatprep.subr.mxu1 %v3350_v42 }
 0x69d   :  { %1496 = vmatpush1.msra.mxu0 %v3037_v12  ;;  %2229 = vmatpush3.msra.mxu1 %v3159_v38  ;;  %v1679_v38 = vld [vmem:[#allocation2 + $0x350] sm:$0xff] }
 0x69e   :  { %1497 = vmatprep.subr.mxu0 %v3041_v58  ;;  %2230 = vmatprep.subr.mxu1 %v3350_v42 }
 0x69f   :  { %1498 = vmatpush1.msra.mxu0 %v3045_v13  ;;  %2231 = vmatpush3.msra.mxu1 %v3165_v26  ;;  %v1678_v26 = vld [vmem:[#allocation2 + $0x348] sm:$0xff] }
 0x6a0   :  { %1499 = vmatprep.subr.mxu0 %v3049_v59  ;;  %2232 = vmatprep.subr.mxu1 %v3350_v42 }
 0x6a1   :  { %1500 = vmatpush1.msra.mxu0 %v3053_v17  ;;  %2233 = vmatpush3.msra.mxu1 %v3171_v39  ;;  %v1677_v39 = vld [vmem:[#allocation2 + $0x338] sm:$0xff] }
 0x6a2   :  { %1501 = vmatprep.subr.mxu0 %v3057_v60  ;;  %2234 = vmatprep.subr.mxu1 %v3350_v42 }
 0x6a3   :  { %1502 = vmatpush1.msra.mxu0 %v3061_v20  ;;  %2235 = vmatpush3.msra.mxu1 %v3177_v0  ;;  %v1676_v0 = vld [vmem:[#allocation2 + $0x330] sm:$0xff] }
 0x6a4   :  { %1503 = vmatprep.subr.mxu0 %v3065_v61  ;;  %2236 = vmatprep.subr.mxu1 %v3350_v42 }
 0x6a5   :  { %1504 = vmatpush1.msra.mxu0 %v3069_v22  ;;  %2237 = vmatpush3.msra.mxu1 %v3381_v15  ;;  %v1659_v15 = vld [vmem:[#allocation2 + $0x260] sm:$0xff] }
 0x6a6   :  { %1505 = vmatprep.subr.mxu0 %v3382_v24  ;;  %2238 = vmatprep.subr.mxu1 %v3350_v42  ;;  %v1658_v24 = vld [vmem:[#allocation2 + $0x258] sm:$0xff] }
 0x6a7   :  { %1506 = vmatpush1.msra.mxu0 %v3383_v44  ;;  %2239 = vmatpush3.msra.mxu1 %v3384_v46  ;;  %v1657_v44 = vld [vmem:[#allocation2 + $0x248] sm:$0xff]  ;;  %v1656_v46 = vld [vmem:[#allocation2 + $0x240] sm:$0xff] }
 0x6a8   :  { %1507 = vmatprep.subr.mxu0 %v3385_v45  ;;  %2240 = vmatprep.subr.mxu1 %v3350_v42  ;;  %v1655_v45 = vld [vmem:[#allocation2 + $0x230] sm:$0xff] }
 0x6a9   :  { %1508 = vmatpush1.msra.mxu0 %v3386_v21  ;;  %1541 = vmatprep.mubr.f32.mxu0 %v3350_v42  ;;  %v1654_v21 = vld [vmem:[#allocation2 + $0x228] sm:$0xff] }
 0x6aa   :  { %2241 = vmatpush3.msra.mxu1 %v3387_v51  ;;  %2242 = vmatprep.mubr.msk.f32.mxu1 %vm2434_vm2, %v3350_v42  ;;  %v1653_v51 = vld [vmem:[#allocation2 + $0x218] sm:$0xff] }
 0x6ab   :  { %1693 = vmatprep.subr.mxu0 %v1681_v36  ;;  %v1683_v36 = vld [vmem:[#allocation2 + $0x378] ss:$8 sm:$0x7] }
 0x74a   :  { %v1367_v40 = vpop.f32.mrf.mxu0  ;;  %v1438_v52 = vpop.f32.mrf.mxu1 }
 0x74b   :  { %v1368_v53 = vadd.f32 %v1367_v40, %v3388_v16  ;;  %v1439_v17 = vadd.f32 %v1438_v52, %v2724_v3  ;;  %v1652_v40 = vld [vmem:[#allocation2 + $0x210] sm:$0xff]  ;;  %v1651_v52 = vld [vmem:[#allocation2 + $0x200] sm:$0xff] }
 0x74c   :  { %v1369_v5 = vpop.f32.mrf.mxu0  ;;  %v2209_v54 = vpop.f32.mrf.mxu1 }
 0x74d   :  { %v1444_v6 = vrot.slane %v1368_v53, 2  ;;  %v1370_v55 = vadd.f32 %v1369_v5, %v2717_v43  ;;  %v1463_v20 = vrot.slane %v1439_v17, 2  ;;  %v1650_v53 = vld [vmem:[#allocation2 + $0x1f8] sm:$0xff] }
 0x74f   :  { %v1448_v8 = vadd.f32 %v1444_v6, %v3356_v23  ;;  %v1445_v9 = vrot.slane %v1370_v55, 2 }
 0x751   :  { %v1809_v56 = vmul.f32 -1.442695, %v1448_v8  ;;  %v1449_v57 = vadd.f32 %v1445_v9, %v2715_v47 }
 0x753   :  { %2313 = vpow2.f32 %v1809_v56  ;;  %v1810_v12 = vmul.f32 -1.442695, %v1449_v57 }
 0x755   :  { %2315 = vpow2.f32 %v1810_v12 }
 0x760   :  { %v2314_v58 = vpop.eup %2313 }
 0x761   :  { %v1456_v13 = vadd.f32 1.0, %v2314_v58 }
 0x762   :  { %v2316_v59 = vpop.eup %2315 }
 0x763   :  { %2317 = vrcp.f32 %v1456_v13  ;;  %v1457_v60 = vadd.f32 1.0, %v2316_v59 }
 0x765   :  { %2319 = vrcp.f32 %v1457_v60 }
 0x770   :  { %v2318_v61 = vpop.eup %2317 }
 0x771   :  { %v1465_v22 = vmul.f32 %v2318_v61, %v1463_v20 }
 0x772   :  { %v2320_v30 = vpop.eup %2319 }
 0x773   :  { %v1466_v62 = vadd.f32 %v1465_v22, %v2719_v49  ;;  %v1468_v19 = vsub.f32 1.0, %v2320_v30  ;;  %v1472_v34 = vmul.f32 %v2320_v30, %v1470_v7 }
 0x775   :  { %2321 = vtanh.f32 %v1466_v62 }
 0x782   :  { %v2322_v32 = vpop.eup %2321 }
 0x783   :  { %v1469_v33 = vmul.f32 %v2322_v32, %v1468_v19 }
 0x785   :  { %v3285_v10 = vadd.f32 %v1472_v34, %v1469_v33 }
 0x787   :  { %v1475_v35 = vrot.slane %v3285_v10, 6  ;;  %v1646_v7 = vrot.slane %v3285_v10, 7 }
 0x789   :  { %1542 = vmatmul.mubr.f32.vlgmr.msra.gmra.mxu0 %v1475_v35  ;;  %2243 = vmatmul.mubr.f32.vlgmr.msra.gmra.mxu1 %v1475_v35 }
 0x78a   :  { %1757 = vmatprep.mubr.f32.mxu0 %v3350_v42  ;;  %1694 = vmatpush1.msra.mxu0 %v1680_v37  ;;  %v1671_v42 = vld [vmem:[#allocation2 + $0x2f0] sm:$0xff] }
 0x78b   :  { %1695 = vmatprep.subr.mxu0 %v1679_v38 }
 0x78c   :  { %1696 = vmatpush1.msra.mxu0 %v1678_v26 }
 0x78d   :  { %1697 = vmatprep.subr.mxu0 %v1677_v39 }
 0x78e   :  { %1698 = vmatpush1.msra.mxu0 %v1676_v0 }
 0x78f   :  { %1699 = vmatprep.subr.mxu0 %v1675_v18 }
 0x790   :  { %1700 = vmatpush1.msra.mxu0 %v1674_v41 }
 0x791   :  { %1701 = vmatprep.subr.mxu0 %v1673_v11 }
 0x792   :  { %1702 = vmatpush1.msra.mxu0 %v1672_v50 }
 0x793   :  { %1703 = vmatprep.subr.mxu0 %v1671_v42 }
 0x794   :  { %1704 = vmatpush1.msra.mxu0 %v1670_v4 }
 0x795   :  { %1705 = vmatprep.subr.mxu0 %v1669_v14 }
 0x796   :  { %1706 = vmatpush1.msra.mxu0 %v1668_v2 }
 0x797   :  { %1707 = vmatprep.subr.mxu0 %v1667_v28 }
 0x798   :  { %1708 = vmatpush1.msra.mxu0 %v1666_v27 }
 0x799   :  { %1709 = vmatprep.subr.mxu0 %v1665_v48 }
 0x79a   :  { %1710 = vmatpush1.msra.mxu0 %v1664_v63 }
 0x79b   :  { %1711 = vmatprep.subr.mxu0 %v1663_v1 }
 0x79c   :  { %1712 = vmatpush1.msra.mxu0 %v1662_v29 }
 0x79d   :  { %1713 = vmatprep.subr.mxu0 %v1661_v31 }
 0x79e   :  { %1714 = vmatpush1.msra.mxu0 %v1660_v25 }
 0x79f   :  { %1715 = vmatprep.subr.mxu0 %v1659_v15 }
 0x7a0   :  { %1716 = vmatpush1.msra.mxu0 %v1658_v24 }
 0x7a1   :  { %1717 = vmatprep.subr.mxu0 %v1657_v44 }
 0x7a2   :  { %1718 = vmatpush1.msra.mxu0 %v1656_v46 }
 0x7a3   :  { %1719 = vmatprep.subr.mxu0 %v1655_v45 }
 0x7a4   :  { %1720 = vmatpush1.msra.mxu0 %v1654_v21 }
 0x7a5   :  { %1721 = vmatprep.subr.mxu0 %v1653_v51 }
 0x7a6   :  { %1722 = vmatpush1.msra.mxu0 %v1652_v40 }
 0x7a7   :  { %1723 = vmatprep.subr.mxu0 %v1651_v52 }
 0x7a8   :  { %1724 = vmatpush1.msra.mxu0 %v1650_v53 }
 0x849   :  { %v1543_v5 = vpop.f32.mrf.mxu0  ;;  %v1614_v54 = vpop.f32.mrf.mxu1 }
 0x84a   :  { %v1544_v6 = vadd.f32 %v1543_v5, %v3388_v16  ;;  %v1615_v16 = vadd.f32 %v1614_v54, %v2724_v3  ;;  %v3389_v3 = vld [vmem:[#allocation16_spill] sm:$0xff] }
 0x84b   :  { %v1545_v55 = vpop.f32.mrf.mxu0  ;;  %v2244_v8 = vpop.f32.mrf.mxu1  ;;  %v3390_v37 = vsub.s32 0, %v3389_v3 }
 0x84c   :  { %v1620_v56 = vrot.slane %v1544_v6, 1  ;;  %v1546_v9 = vadd.f32 %v1545_v55, %v2717_v43  ;;  %v1639_v22 = vrot.slane %v1615_v16, 1 }
 0x84d   :  { %v1691_v38 = vrot.slane %v1683_v36, %v3390_v37 }
 0x84e   :  { %v1624_v57 = vadd.f32 %v1620_v56, %v3356_v23  ;;  %v1621_v58 = vrot.slane %v1546_v9, 1 }
 0x850   :  { %v1811_v12 = vmul.f32 -1.442695, %v1624_v57  ;;  %v1625_v13 = vadd.f32 %v1621_v58, %v2715_v47 }
 0x852   :  { %2323 = vpow2.f32 %v1811_v12  ;;  %v1812_v59 = vmul.f32 -1.442695, %v1625_v13 }
 0x854   :  { %2325 = vpow2.f32 %v1812_v59 }
 0x85f   :  { %v2324_v17 = vpop.eup %2323 }
 0x860   :  { %v1632_v60 = vadd.f32 1.0, %v2324_v17 }
 0x861   :  { %v2326_v20 = vpop.eup %2325 }
 0x862   :  { %2327 = vrcp.f32 %v1632_v60  ;;  %v1633_v61 = vadd.f32 1.0, %v2326_v20 }
 0x864   :  { %2329 = vrcp.f32 %v1633_v61 }
 0x86f   :  { %v2328_v62 = vpop.eup %2327 }
 0x870   :  { %v1641_v30 = vmul.f32 %v2328_v62, %v1639_v22 }
 0x871   :  { %v2330_v23 = vpop.eup %2329 }
 0x872   :  { %v1642_v43 = vadd.f32 %v1641_v30, %v2719_v49  ;;  %v1644_v47 = vsub.f32 1.0, %v2330_v23  ;;  %v1648_v33 = vmul.f32 %v2330_v23, %v1646_v7 }
 0x874   :  { %2331 = vtanh.f32 %v1642_v43 }
 0x881   :  { %v2332_v19 = vpop.eup %2331 }
 0x882   :  { %v1645_v32 = vmul.f32 %v2332_v19, %v1644_v47 }
 0x884   :  { %v1649_v34 = vadd.f32 %v1648_v33, %v1645_v32 }
 0x886   :  { %v1685_v35 = vrot.slane %v1649_v34, 7 }
 0x888   :  { %1758 = vmatmul.mubr.f32.vlgmr.msra.gmra.mxu0 %v1685_v35 }
 0x948   :  { %v1759_v26 = vpop.f32.mrf.mxu0 }
 0x949   :  { %v1760_v39 = vadd.f32 %v1759_v26, %v1691_v38 }
 0x94a   :  { %v1761_v0 = vpop.f32.mrf.mxu0 }
 0x94b   :  { %v1763_v49 = vmax.f32 %v1760_v39, 0.0 }
 0x94d   :  { %v1765_v18 = vsel %vm1764_vm3, %v1763_v49, -inf }
 0x94e   :  { %1766 = vmax.xlane.f32.xlu0 %v1765_v18 }
 0x9d7   :  { %v1767_v10 = vpop.xlane.xlu0 %1766 }
 0x9d8   :  { %v1768_v41 = vsub.f32 %v1763_v49, %v1767_v10 }
 0x9da   :  { %v1769_v11 = vmul.f32 1.442695, %v1768_v41 }
 0x9dc   :  { %2333 = vpow2.f32 %v1769_v11 }
 0x9e9   :  { %v2334_v50 = vpop.eup %2333 }
 0x9ea   :  { %v1771_v42 = vsel %vm1764_vm3, %v2334_v50, 0.0 }
 0x9eb   :  { %1772 = vadd.xlane.f32.xlu1 %v1771_v42 }
 0xa74   :  { %v1773_v4 = vpop.xlane.xlu1 %1772 }
 0xa75   :  { %2335 = vlog2.f32 %v1773_v4 }
 0xa82   :  { %v2336_v14 = vpop.eup %2335 }
 0xa83   :  { %v1775_v2 = vmul.f32 0.6931472, %v2336_v14 }
 0xa85   :  { %v1776_v28 = vadd.f32 %v1775_v2, %v1767_v10 }
 0xa87   :  { %v1777_v27 = vsub.f32 %v1763_v49, %v1776_v28 }
 0xa89   :  { %1778 = vst.msk [vmem:[#allocation5] sm:$0x1] %vm1764_vm3, %v1777_v27 }
 0xa8a   :  { %2416 = shalt.err (!%p2413_p9)
}
 0xa8b   :  { %1788 = dma.vmem_to_hbm [thread:$0]  %s1786_s1, 16, %s3306_s2, [#allocation4]  }
 0xa8c   :  { %2427 = dma.done.wait [#allocation4], 16  }
 0xa8d   :  { %2428 = vsyncadd [#allocation4], 4294967280 }
 0xa8e   :  { %1792 = vsyncpa [#allocation3], 1 }
 0xa8f   :  { %1793 = vsyncpa [#allocation4], 1 }

</bundles_post_ra>
